<compile_context>
chip_gen: v6e
topology: v6e:2x2x1
jax: 0.10.0
libtpu: 0.0.40
codegen_flags: <defaults>
</compile_context>

<pallas_src>
import functools
import math

import jax
import jax.numpy as jnp
from jax import lax
from jax.experimental import pallas as pl
from jax.experimental.pallas import tpu as pltpu

VMEM_SPEC = pl.BlockSpec(memory_space=pltpu.MemorySpace.VMEM)


# ------------------------------ fused kernel -------------------------------- #

def _sccgc_fused_kernel(
    # inputs
    x_ref, adj_ref,
    w1cat, be1, we2, be2, we3, be3, wz, bz,
    wd1, bd1, wd2, bd2, wd3, bd3, wxb, bxb,
    g2, g3, g4, g5, g6, g7, g8,
    mu_t_ref,
    # outputs
    slab_ref, adjhat_ref,
    *, a, v, d_enc1, slab_w,
):
    f32 = jnp.float32
    bf16 = jnp.bfloat16

    x = x_ref[...]                     # f32 (N, n_input)
    x_bf = x.astype(bf16)              # single cast, feeds the packed stage-1 matmul
    adj = adj_ref[...]                 # bf16 (N, N) — the only adj copy in VMEM

    def mxdot(lhs_f32, w_ref):
        # MXU path: bf16 operands (weights pre-cast host-side), f32 accumulation.
        return jnp.dot(lhs_f32.astype(bf16), w_ref[...], preferred_element_type=f32)

    def linear(h, w_ref, b_ref, relu):
        y = mxdot(h, w_ref) + b_ref[...]
        return jnp.maximum(y, 0.0) if relu else y

    def gnn(h, w_ref, relu):
        # GNNLayer: adj @ (h @ W), optional ReLU.  bf16 operands, f32 accumulation.
        support = mxdot(h, w_ref)
        y = jnp.dot(adj, support.astype(bf16), preferred_element_type=f32)
        return jnp.maximum(y, 0.0) if relu else y

    # --------- stage 1: [we1 | g1] packed to 128 lanes, one MXU matmul ------- #
    y1 = jnp.dot(x_bf, w1cat[...], preferred_element_type=f32)      # (N, 128)
    enc_h1 = jnp.maximum(y1[:, :d_enc1] + be1[...], 0.0)            # AE enc1
    support1 = y1[:, d_enc1:]                                       # GNN-1 support
    gae_enc1 = jnp.maximum(
        jnp.dot(adj, support1.astype(bf16), preferred_element_type=f32), 0.0)

    # ---------------------------- AE ---------------------------------------- #
    enc_h2 = linear(enc_h1, we2, be2, True)
    enc_h3 = linear(enc_h2, we3, be3, True)
    z_ae = linear(enc_h3, wz, bz, False)
    dec_h1 = linear(z_ae, wd1, bd1, True)
    dec_h2 = linear(dec_h1, wd2, bd2, True)
    dec_h3 = linear(dec_h2, wd3, bd3, True)
    x_bar = linear(dec_h3, wxb, bxb, False)

    # -------------------- GNN encoder (mixing fused in-kernel) -------------- #
    gae_enc2 = gnn((1.0 - a) * gae_enc1 + a * enc_h1, g2, True)
    gae_enc3 = gnn((1.0 - a) * gae_enc2 + a * enc_h2, g3, True)
    z_gae = gnn((1.0 - a) * gae_enc3 + a * enc_h3, g4, False)

    z_i = (1.0 - a) * z_gae + a * z_ae
    # torch.spmm(adj, z_i): bf16 operands, f32 accumulation (single adj copy).
    z_l = jnp.dot(adj, z_i.astype(bf16), preferred_element_type=f32)

    # ----------------------------- GNN decoder ------------------------------ #
    gae_dec1 = gnn(z_gae, g5, True)
    gae_dec2 = gnn(gae_dec1, g6, True)
    gae_dec3 = gnn(gae_dec2, g7, True)
    z_hat = gnn(gae_dec3, g8, True)    # active=True, matching the reference

    # ----------- inner-product decoder: sigmoid(Z Z^T), no transpose -------- #
    z_gae_bf = z_gae.astype(bf16)
    s = lax.dot_general(z_gae_bf, z_gae_bf,
                        dimension_numbers=(((1,), (1,)), ((), ())),
                        preferred_element_type=f32)
    adj_hat = 1.0 / (1.0 + jnp.exp(-s))          # exact sigmoid -> in [0, 1]

    # -------------------- Student-t soft assignments ------------------------ #
    mu_t = mu_t_ref[...]                                       # (n_z, K), f32
    mmu = jnp.sum(mu_t * mu_t, axis=0, keepdims=True)          # (1, K)
    exponent = (v + 1.0) / 2.0

    def student_t(z):
        zz = jnp.sum(z * z, axis=1, keepdims=True)             # (N, 1)
        cross = lax.dot_general(z, mu_t,
                                dimension_numbers=(((1,), (0,)), ((), ())),
                                preferred_element_type=f32)    # (N, K)
        d2 = jnp.maximum(zz + mmu - 2.0 * cross, 0.0)          # clamp cancellation
        qv = 1.0 / (1.0 + d2 / v)
        if exponent != 1.0:                                    # static branch
            qv = qv ** exponent
        # exact row normalization -> rows sum to 1 to machine precision
        return qv / jnp.sum(qv, axis=1, keepdims=True)

    q = student_t(z_l)
    q1 = student_t(z_ae)

    # ----------------- lane-dense packed output slab (N, 128) ---------------- #
    parts = [x_bar, z_hat, z_ae, z_l, enc_h3, q, q1]
    used = sum(p.shape[1] for p in parts)
    if slab_w > used:
        parts.append(jnp.zeros((x_bar.shape[0], slab_w - used), f32))
    slab_ref[...] = jnp.concatenate(parts, axis=1)
    adjhat_ref[...] = adj_hat


# ------------------------------ wrapper -------------------------------------- #

def sccgc_forward(params, x, adj, *, a=0.5, v=1.0):
    ae = params["ae"]
    g = params["gnn"]
    mu_t = params["cluster_t"]                     # (n_z, K), f32

    n, n_input = x.shape
    n_z, k = mu_t.shape
    d_enc1 = ae["enc1"][0].shape[1]
    d_enc3 = ae["enc3"][0].shape[1]

    bf16 = jnp.bfloat16

    def wbf(t):
        return t.astype(bf16)

    # Host-side bf16 casting of all matmul operands; pack [we1 | g1] (shared LHS x).
    w1cat = jnp.concatenate([ae["enc1"][0], g["g1"]], axis=1).astype(bf16)

    inputs = (
        x,                                # f32 data
        adj.astype(bf16),                 # single bf16 adjacency copy
        w1cat, ae["enc1"][1],
        wbf(ae["enc2"][0]), ae["enc2"][1],
        wbf(ae["enc3"][0]), ae["enc3"][1],
        wbf(ae["z"][0]),    ae["z"][1],
        wbf(ae["dec1"][0]), ae["dec1"][1],
        wbf(ae["dec2"][0]), ae["dec2"][1],
        wbf(ae["dec3"][0]), ae["dec3"][1],
        wbf(ae["xbar"][0]), ae["xbar"][1],
        wbf(g["g2"]), wbf(g["g3"]), wbf(g["g4"]),
        wbf(g["g5"]), wbf(g["g6"]), wbf(g["g7"]), wbf(g["g8"]),
        mu_t,
    )

    # Packed output slab layout (lane-dense, padded to a multiple of 128).
    widths = [n_input, n_input, n_z, n_z, d_enc3, k, k]
    total = sum(widths)
    slab_w = max(128, ((total + 127) // 128) * 128)

    out_shapes = (
        jax.ShapeDtypeStruct((n, slab_w), jnp.float32),    # packed slab
        jax.ShapeDtypeStruct((n, n), jnp.float32),         # adj_hat
    )

    kernel = functools.partial(_sccgc_fused_kernel, a=float(a), v=float(v),
                               d_enc1=d_enc1, slab_w=slab_w)
    slab, adj_hat = pl.pallas_call(
        kernel,
        out_shape=out_shapes,
        in_specs=[VMEM_SPEC] * len(inputs),
        out_specs=tuple([VMEM_SPEC] * len(out_shapes)),
        compiler_params=pltpu.CompilerParams(vmem_limit_bytes=64 * 1024 * 1024),
    )(*inputs)

    # Static slices in the XLA wrapper — cheap, keeps the kernel store lane-dense.
    offs = [0]
    for w in widths:
        offs.append(offs[-1] + w)
    x_bar  = slab[:, offs[0]:offs[1]]
    z_hat  = slab[:, offs[1]:offs[2]]
    z_ae   = slab[:, offs[2]:offs[3]]
    z_l    = slab[:, offs[3]:offs[4]]
    enc_h3 = slab[:, offs[4]:offs[5]]
    q      = slab[:, offs[5]:offs[6]]
    q1     = slab[:, offs[6]:offs[7]]
    return x_bar, z_hat, adj_hat, z_ae, q, q1, z_l, enc_h3


# ------------------------------ parameters ----------------------------------- #

def _linear_init(key, fan_in, fan_out):
    kw, kb = jax.random.split(key)
    bound = 1.0 / math.sqrt(fan_in)
    w = jax.random.uniform(kw, (fan_in, fan_out), jnp.float32, -bound, bound)
    b = jax.random.uniform(kb, (1, fan_out), jnp.float32, -bound, bound)
    return w, b


def _gnn_init(key, fan_in, fan_out):
    bound = math.sqrt(6.0 / (fan_in + fan_out))        # xavier_uniform
    return jax.random.uniform(key, (fan_in, fan_out), jnp.float32, -bound, bound)


def make_params(key, dims):
    d = dims
    keys = jax.random.split(key, 20)
    ae = {
        "enc1": _linear_init(keys[0], d["n_input"], d["ae_enc1"]),
        "enc2": _linear_init(keys[1], d["ae_enc1"], d["ae_enc2"]),
        "enc3": _linear_init(keys[2], d["ae_enc2"], d["ae_enc3"]),
        "z":    _linear_init(keys[3], d["ae_enc3"], d["n_z"]),
        "dec1": _linear_init(keys[4], d["n_z"],     d["ae_dec1"]),
        "dec2": _linear_init(keys[5], d["ae_dec1"], d["ae_dec2"]),
        "dec3": _linear_init(keys[6], d["ae_dec2"], d["ae_dec3"]),
        "xbar": _linear_init(keys[7], d["ae_dec3"], d["n_input"]),
    }
    gnn_w = {
        "g1": _gnn_init(keys[8],  d["n_input"],  d["gae_enc1"]),
        "g2": _gnn_init(keys[9],  d["gae_enc1"], d["gae_enc2"]),
        "g3": _gnn_init(keys[10], d["gae_enc2"], d["gae_enc3"]),
        "g4": _gnn_init(keys[11], d["gae_enc3"], d["n_z"]),
        "g5": _gnn_init(keys[12], d["n_z"],      d["gae_dec1"]),
        "g6": _gnn_init(keys[13], d["gae_dec1"], d["gae_dec2"]),
        "g7": _gnn_init(keys[14], d["gae_dec2"], d["gae_dec3"]),
        "g8": _gnn_init(keys[15], d["gae_dec3"], d["n_input"]),
        # gae_fc (n_z -> n_clusters) exists in __init__ but is unused in forward.
    }
    # cluster_layer: xavier_normal_ (K, n_z); stored transposed (n_z, K).
    std = math.sqrt(2.0 / (d["n_clusters"] + d["n_z"]))
    cluster = std * jax.random.normal(keys[16], (d["n_clusters"], d["n_z"]), jnp.float32)
    return {"ae": ae, "gnn": gnn_w, "cluster_t": cluster.T}


# --------------------------------- main --------------------------------------- #

if __name__ == "__main__":
    dims = dict(
        n_input=32,
        ae_enc1=64, ae_enc2=32, ae_enc3=16,
        ae_dec1=16, ae_dec2=32, ae_dec3=64,
        gae_enc1=64, gae_enc2=32, gae_enc3=16,   # must match AE enc dims (feature mixing)
        gae_dec1=16, gae_dec2=32, gae_dec3=64,
        n_z=8, n_clusters=4,
    )
    N = 16
    v = 1.0

    root = jax.random.PRNGKey(0)
    k_param, k_x, k_adj = jax.random.split(root, 3)

    params = make_params(k_param, dims)

    x = jax.random.normal(k_x, (N, dims["n_input"]), jnp.float32)

    # deterministic row-normalised adjacency with self loops
    a_raw = jax.random.uniform(k_adj, (N, N), jnp.float32)
    a_sym = 0.5 * (a_raw + a_raw.T) + jnp.eye(N, dtype=jnp.float32)
    adj = a_sym / jnp.sum(a_sym, axis=1, keepdims=True)

    outs = sccgc_forward(params, x, adj, a=0.5, v=v)
    outs = jax.block_until_ready(outs)
    x_bar, z_hat, adj_hat, z_ae, q, q1, z_l, enc_h3 = outs

    # sanity checks
    assert x_bar.shape == (N, dims["n_input"])
    assert z_hat.shape == (N, dims["n_input"])
    assert adj_hat.shape == (N, N)
    assert z_ae.shape == (N, dims["n_z"])
    assert z_l.shape == (N, dims["n_z"])
    assert q.shape == (N, dims["n_clusters"]) and q1.shape == (N, dims["n_clusters"])
    assert enc_h3.shape == (N, dims["ae_enc3"])
    for o in outs:
        assert bool(jnp.all(jnp.isfinite(o)))
    assert bool(jnp.allclose(jnp.sum(q, axis=1), 1.0, atol=1e-3))
    assert bool(jnp.allclose(jnp.sum(q1, axis=1), 1.0, atol=1e-3))
    assert bool(jnp.all(adj_hat >= 0.0)) and bool(jnp.all(adj_hat <= 1.0))

    print("KERNEL_OK")
</pallas_src>

<mosaic_0001>
module attributes {stable_mosaic.version = 11 : i64} {
  func.func @_sccgc_fused_kernel(%arg0: memref<16x32xf32, #tpu.memory_space<vmem>>, %arg1: memref<16x16xbf16, #tpu.memory_space<vmem>>, %arg2: memref<32x128xbf16, #tpu.memory_space<vmem>>, %arg3: memref<1x64xf32, #tpu.memory_space<vmem>>, %arg4: memref<64x32xbf16, #tpu.memory_space<vmem>>, %arg5: memref<1x32xf32, #tpu.memory_space<vmem>>, %arg6: memref<32x16xbf16, #tpu.memory_space<vmem>>, %arg7: memref<1x16xf32, #tpu.memory_space<vmem>>, %arg8: memref<16x8xbf16, #tpu.memory_space<vmem>>, %arg9: memref<1x8xf32, #tpu.memory_space<vmem>>, %arg10: memref<8x16xbf16, #tpu.memory_space<vmem>>, %arg11: memref<1x16xf32, #tpu.memory_space<vmem>>, %arg12: memref<16x32xbf16, #tpu.memory_space<vmem>>, %arg13: memref<1x32xf32, #tpu.memory_space<vmem>>, %arg14: memref<32x64xbf16, #tpu.memory_space<vmem>>, %arg15: memref<1x64xf32, #tpu.memory_space<vmem>>, %arg16: memref<64x32xbf16, #tpu.memory_space<vmem>>, %arg17: memref<1x32xf32, #tpu.memory_space<vmem>>, %arg18: memref<64x32xbf16, #tpu.memory_space<vmem>>, %arg19: memref<32x16xbf16, #tpu.memory_space<vmem>>, %arg20: memref<16x8xbf16, #tpu.memory_space<vmem>>, %arg21: memref<8x16xbf16, #tpu.memory_space<vmem>>, %arg22: memref<16x32xbf16, #tpu.memory_space<vmem>>, %arg23: memref<32x64xbf16, #tpu.memory_space<vmem>>, %arg24: memref<64x32xbf16, #tpu.memory_space<vmem>>, %arg25: memref<8x4xf32, #tpu.memory_space<vmem>>, %arg26: memref<16x128xf32, #tpu.memory_space<vmem>>, %arg27: memref<16x16xf32, #tpu.memory_space<vmem>>) attributes {dimension_semantics = [], scalar_prefetch = 0 : i64, scratch_operands = 0 : i64, tpu.core_type = #tpu.core_type<tc>} {
    %c0 = arith.constant 0 : index
    %c0_0 = arith.constant 0 : index
    %0 = vector.load %arg0[%c0, %c0_0] : memref<16x32xf32, #tpu.memory_space<vmem>>, vector<16x32xf32>
    %1 = arith.truncf %0 : vector<16x32xf32> to vector<16x32xbf16>
    %c0_1 = arith.constant 0 : index
    %c0_2 = arith.constant 0 : index
    %2 = vector.load %arg1[%c0_1, %c0_2] : memref<16x16xbf16, #tpu.memory_space<vmem>>, vector<16x16xbf16>
    %c0_3 = arith.constant 0 : index
    %c0_4 = arith.constant 0 : index
    %3 = vector.load %arg2[%c0_3, %c0_4] : memref<32x128xbf16, #tpu.memory_space<vmem>>, vector<32x128xbf16>
    %cst = arith.constant dense<0.000000e+00> : vector<16x128xf32>
    %4 = tpu.matmul %1, %3, %cst {dimension_numbers = #tpu.dot_dimension_numbers<[1], [0], [0], [1], [0, 0, 1, 1], [], []>} : vector<16x32xbf16>, vector<32x128xbf16>, vector<16x128xf32> -> vector<16x128xf32>
    %5 = vector.extract_strided_slice %4 {offsets = [0, 0], sizes = [16, 64], strides = [1, 1]} : vector<16x128xf32> to vector<16x64xf32>
    %c0_5 = arith.constant 0 : index
    %c0_6 = arith.constant 0 : index
    %6 = vector.load %arg3[%c0_5, %c0_6] : memref<1x64xf32, #tpu.memory_space<vmem>>, vector<1x64xf32>
    %7 = vector.broadcast %6 : vector<1x64xf32> to vector<16x64xf32>
    %8 = arith.addf %5, %7 : vector<16x64xf32>
    %cst_7 = arith.constant 0.000000e+00 : f32
    %9 = vector.broadcast %cst_7 : f32 to vector<16x64xf32>
    %10 = arith.maximumf %8, %9 : vector<16x64xf32>
    %11 = vector.extract_strided_slice %4 {offsets = [0, 64], sizes = [16, 64], strides = [1, 1]} : vector<16x128xf32> to vector<16x64xf32>
    %12 = arith.truncf %11 : vector<16x64xf32> to vector<16x64xbf16>
    %cst_8 = arith.constant dense<0.000000e+00> : vector<16x64xf32>
    %13 = tpu.matmul %2, %12, %cst_8 {dimension_numbers = #tpu.dot_dimension_numbers<[1], [0], [0], [1], [0, 0, 1, 1], [], []>} : vector<16x16xbf16>, vector<16x64xbf16>, vector<16x64xf32> -> vector<16x64xf32>
    %cst_9 = arith.constant 0.000000e+00 : f32
    %14 = vector.broadcast %cst_9 : f32 to vector<16x64xf32>
    %15 = arith.maximumf %13, %14 : vector<16x64xf32>
    %16 = arith.truncf %10 : vector<16x64xf32> to vector<16x64xbf16>
    %c0_10 = arith.constant 0 : index
    %c0_11 = arith.constant 0 : index
    %17 = vector.load %arg4[%c0_10, %c0_11] : memref<64x32xbf16, #tpu.memory_space<vmem>>, vector<64x32xbf16>
    %cst_12 = arith.constant dense<0.000000e+00> : vector<16x32xf32>
    %18 = tpu.matmul %16, %17, %cst_12 {dimension_numbers = #tpu.dot_dimension_numbers<[1], [0], [0], [1], [0, 0, 1, 1], [], []>} : vector<16x64xbf16>, vector<64x32xbf16>, vector<16x32xf32> -> vector<16x32xf32>
    %c0_13 = arith.constant 0 : index
    %c0_14 = arith.constant 0 : index
    %19 = vector.load %arg5[%c0_13, %c0_14] : memref<1x32xf32, #tpu.memory_space<vmem>>, vector<1x32xf32>
    %20 = vector.broadcast %19 : vector<1x32xf32> to vector<16x32xf32>
    %21 = arith.addf %18, %20 : vector<16x32xf32>
    %cst_15 = arith.constant 0.000000e+00 : f32
    %22 = vector.broadcast %cst_15 : f32 to vector<16x32xf32>
    %23 = arith.maximumf %21, %22 : vector<16x32xf32>
    %24 = arith.truncf %23 : vector<16x32xf32> to vector<16x32xbf16>
    %c0_16 = arith.constant 0 : index
    %c0_17 = arith.constant 0 : index
    %25 = vector.load %arg6[%c0_16, %c0_17] : memref<32x16xbf16, #tpu.memory_space<vmem>>, vector<32x16xbf16>
    %cst_18 = arith.constant dense<0.000000e+00> : vector<16x16xf32>
    %26 = tpu.matmul %24, %25, %cst_18 {dimension_numbers = #tpu.dot_dimension_numbers<[1], [0], [0], [1], [0, 0, 1, 1], [], []>} : vector<16x32xbf16>, vector<32x16xbf16>, vector<16x16xf32> -> vector<16x16xf32>
    %c0_19 = arith.constant 0 : index
    %c0_20 = arith.constant 0 : index
    %27 = vector.load %arg7[%c0_19, %c0_20] : memref<1x16xf32, #tpu.memory_space<vmem>>, vector<1x16xf32>
    %28 = vector.broadcast %27 : vector<1x16xf32> to vector<16x16xf32>
    %29 = arith.addf %26, %28 : vector<16x16xf32>
    %cst_21 = arith.constant 0.000000e+00 : f32
    %30 = vector.broadcast %cst_21 : f32 to vector<16x16xf32>
    %31 = arith.maximumf %29, %30 : vector<16x16xf32>
    %32 = arith.truncf %31 : vector<16x16xf32> to vector<16x16xbf16>
    %c0_22 = arith.constant 0 : index
    %c0_23 = arith.constant 0 : index
    %33 = vector.load %arg8[%c0_22, %c0_23] : memref<16x8xbf16, #tpu.memory_space<vmem>>, vector<16x8xbf16>
    %cst_24 = arith.constant dense<0.000000e+00> : vector<16x8xf32>
    %34 = tpu.matmul %32, %33, %cst_24 {dimension_numbers = #tpu.dot_dimension_numbers<[1], [0], [0], [1], [0, 0, 1, 1], [], []>} : vector<16x16xbf16>, vector<16x8xbf16>, vector<16x8xf32> -> vector<16x8xf32>
    %c0_25 = arith.constant 0 : index
    %c0_26 = arith.constant 0 : index
    %35 = vector.load %arg9[%c0_25, %c0_26] : memref<1x8xf32, #tpu.memory_space<vmem>>, vector<1x8xf32>
    %36 = vector.broadcast %35 : vector<1x8xf32> to vector<16x8xf32>
    %37 = arith.addf %34, %36 : vector<16x8xf32>
    %38 = arith.truncf %37 : vector<16x8xf32> to vector<16x8xbf16>
    %c0_27 = arith.constant 0 : index
    %c0_28 = arith.constant 0 : index
    %39 = vector.load %arg10[%c0_27, %c0_28] : memref<8x16xbf16, #tpu.memory_space<vmem>>, vector<8x16xbf16>
    %cst_29 = arith.constant dense<0.000000e+00> : vector<16x16xf32>
    %40 = tpu.matmul %38, %39, %cst_29 {dimension_numbers = #tpu.dot_dimension_numbers<[1], [0], [0], [1], [0, 0, 1, 1], [], []>} : vector<16x8xbf16>, vector<8x16xbf16>, vector<16x16xf32> -> vector<16x16xf32>
    %c0_30 = arith.constant 0 : index
    %c0_31 = arith.constant 0 : index
    %41 = vector.load %arg11[%c0_30, %c0_31] : memref<1x16xf32, #tpu.memory_space<vmem>>, vector<1x16xf32>
    %42 = vector.broadcast %41 : vector<1x16xf32> to vector<16x16xf32>
    %43 = arith.addf %40, %42 : vector<16x16xf32>
    %cst_32 = arith.constant 0.000000e+00 : f32
    %44 = vector.broadcast %cst_32 : f32 to vector<16x16xf32>
    %45 = arith.maximumf %43, %44 : vector<16x16xf32>
    %46 = arith.truncf %45 : vector<16x16xf32> to vector<16x16xbf16>
    %c0_33 = arith.constant 0 : index
    %c0_34 = arith.constant 0 : index
    %47 = vector.load %arg12[%c0_33, %c0_34] : memref<16x32xbf16, #tpu.memory_space<vmem>>, vector<16x32xbf16>
    %cst_35 = arith.constant dense<0.000000e+00> : vector<16x32xf32>
    %48 = tpu.matmul %46, %47, %cst_35 {dimension_numbers = #tpu.dot_dimension_numbers<[1], [0], [0], [1], [0, 0, 1, 1], [], []>} : vector<16x16xbf16>, vector<16x32xbf16>, vector<16x32xf32> -> vector<16x32xf32>
    %c0_36 = arith.constant 0 : index
    %c0_37 = arith.constant 0 : index
    %49 = vector.load %arg13[%c0_36, %c0_37] : memref<1x32xf32, #tpu.memory_space<vmem>>, vector<1x32xf32>
    %50 = vector.broadcast %49 : vector<1x32xf32> to vector<16x32xf32>
    %51 = arith.addf %48, %50 : vector<16x32xf32>
    %cst_38 = arith.constant 0.000000e+00 : f32
    %52 = vector.broadcast %cst_38 : f32 to vector<16x32xf32>
    %53 = arith.maximumf %51, %52 : vector<16x32xf32>
    %54 = arith.truncf %53 : vector<16x32xf32> to vector<16x32xbf16>
    %c0_39 = arith.constant 0 : index
    %c0_40 = arith.constant 0 : index
    %55 = vector.load %arg14[%c0_39, %c0_40] : memref<32x64xbf16, #tpu.memory_space<vmem>>, vector<32x64xbf16>
    %cst_41 = arith.constant dense<0.000000e+00> : vector<16x64xf32>
    %56 = tpu.matmul %54, %55, %cst_41 {dimension_numbers = #tpu.dot_dimension_numbers<[1], [0], [0], [1], [0, 0, 1, 1], [], []>} : vector<16x32xbf16>, vector<32x64xbf16>, vector<16x64xf32> -> vector<16x64xf32>
    %c0_42 = arith.constant 0 : index
    %c0_43 = arith.constant 0 : index
    %57 = vector.load %arg15[%c0_42, %c0_43] : memref<1x64xf32, #tpu.memory_space<vmem>>, vector<1x64xf32>
    %58 = vector.broadcast %57 : vector<1x64xf32> to vector<16x64xf32>
    %59 = arith.addf %56, %58 : vector<16x64xf32>
    %cst_44 = arith.constant 0.000000e+00 : f32
    %60 = vector.broadcast %cst_44 : f32 to vector<16x64xf32>
    %61 = arith.maximumf %59, %60 : vector<16x64xf32>
    %62 = arith.truncf %61 : vector<16x64xf32> to vector<16x64xbf16>
    %c0_45 = arith.constant 0 : index
    %c0_46 = arith.constant 0 : index
    %63 = vector.load %arg16[%c0_45, %c0_46] : memref<64x32xbf16, #tpu.memory_space<vmem>>, vector<64x32xbf16>
    %cst_47 = arith.constant dense<0.000000e+00> : vector<16x32xf32>
    %64 = tpu.matmul %62, %63, %cst_47 {dimension_numbers = #tpu.dot_dimension_numbers<[1], [0], [0], [1], [0, 0, 1, 1], [], []>} : vector<16x64xbf16>, vector<64x32xbf16>, vector<16x32xf32> -> vector<16x32xf32>
    %c0_48 = arith.constant 0 : index
    %c0_49 = arith.constant 0 : index
    %65 = vector.load %arg17[%c0_48, %c0_49] : memref<1x32xf32, #tpu.memory_space<vmem>>, vector<1x32xf32>
    %66 = vector.broadcast %65 : vector<1x32xf32> to vector<16x32xf32>
    %67 = arith.addf %64, %66 : vector<16x32xf32>
    %cst_50 = arith.constant 5.000000e-01 : f32
    %68 = vector.broadcast %cst_50 : f32 to vector<16x64xf32>
    %69 = arith.mulf %68, %15 : vector<16x64xf32>
    %cst_51 = arith.constant 5.000000e-01 : f32
    %70 = vector.broadcast %cst_51 : f32 to vector<16x64xf32>
    %71 = arith.mulf %70, %10 : vector<16x64xf32>
    %72 = arith.addf %69, %71 : vector<16x64xf32>
    %73 = arith.truncf %72 : vector<16x64xf32> to vector<16x64xbf16>
    %c0_52 = arith.constant 0 : index
    %c0_53 = arith.constant 0 : index
    %74 = vector.load %arg18[%c0_52, %c0_53] : memref<64x32xbf16, #tpu.memory_space<vmem>>, vector<64x32xbf16>
    %cst_54 = arith.constant dense<0.000000e+00> : vector<16x32xf32>
    %75 = tpu.matmul %73, %74, %cst_54 {dimension_numbers = #tpu.dot_dimension_numbers<[1], [0], [0], [1], [0, 0, 1, 1], [], []>} : vector<16x64xbf16>, vector<64x32xbf16>, vector<16x32xf32> -> vector<16x32xf32>
    %76 = arith.truncf %75 : vector<16x32xf32> to vector<16x32xbf16>
    %cst_55 = arith.constant dense<0.000000e+00> : vector<16x32xf32>
    %77 = tpu.matmul %2, %76, %cst_55 {dimension_numbers = #tpu.dot_dimension_numbers<[1], [0], [0], [1], [0, 0, 1, 1], [], []>} : vector<16x16xbf16>, vector<16x32xbf16>, vector<16x32xf32> -> vector<16x32xf32>
    %cst_56 = arith.constant 0.000000e+00 : f32
    %78 = vector.broadcast %cst_56 : f32 to vector<16x32xf32>
    %79 = arith.maximumf %77, %78 : vector<16x32xf32>
    %cst_57 = arith.constant 5.000000e-01 : f32
    %80 = vector.broadcast %cst_57 : f32 to vector<16x32xf32>
    %81 = arith.mulf %80, %79 : vector<16x32xf32>
    %cst_58 = arith.constant 5.000000e-01 : f32
    %82 = vector.broadcast %cst_58 : f32 to vector<16x32xf32>
    %83 = arith.mulf %82, %23 : vector<16x32xf32>
    %84 = arith.addf %81, %83 : vector<16x32xf32>
    %85 = arith.truncf %84 : vector<16x32xf32> to vector<16x32xbf16>
    %c0_59 = arith.constant 0 : index
    %c0_60 = arith.constant 0 : index
    %86 = vector.load %arg19[%c0_59, %c0_60] : memref<32x16xbf16, #tpu.memory_space<vmem>>, vector<32x16xbf16>
    %cst_61 = arith.constant dense<0.000000e+00> : vector<16x16xf32>
    %87 = tpu.matmul %85, %86, %cst_61 {dimension_numbers = #tpu.dot_dimension_numbers<[1], [0], [0], [1], [0, 0, 1, 1], [], []>} : vector<16x32xbf16>, vector<32x16xbf16>, vector<16x16xf32> -> vector<16x16xf32>
    %88 = arith.truncf %87 : vector<16x16xf32> to vector<16x16xbf16>
    %cst_62 = arith.constant dense<0.000000e+00> : vector<16x16xf32>
    %89 = tpu.matmul %2, %88, %cst_62 {dimension_numbers = #tpu.dot_dimension_numbers<[1], [0], [0], [1], [0, 0, 1, 1], [], []>} : vector<16x16xbf16>, vector<16x16xbf16>, vector<16x16xf32> -> vector<16x16xf32>
    %cst_63 = arith.constant 0.000000e+00 : f32
    %90 = vector.broadcast %cst_63 : f32 to vector<16x16xf32>
    %91 = arith.maximumf %89, %90 : vector<16x16xf32>
    %cst_64 = arith.constant 5.000000e-01 : f32
    %92 = vector.broadcast %cst_64 : f32 to vector<16x16xf32>
    %93 = arith.mulf %92, %91 : vector<16x16xf32>
    %cst_65 = arith.constant 5.000000e-01 : f32
    %94 = vector.broadcast %cst_65 : f32 to vector<16x16xf32>
    %95 = arith.mulf %94, %31 : vector<16x16xf32>
    %96 = arith.addf %93, %95 : vector<16x16xf32>
    %97 = arith.truncf %96 : vector<16x16xf32> to vector<16x16xbf16>
    %c0_66 = arith.constant 0 : index
    %c0_67 = arith.constant 0 : index
    %98 = vector.load %arg20[%c0_66, %c0_67] : memref<16x8xbf16, #tpu.memory_space<vmem>>, vector<16x8xbf16>
    %cst_68 = arith.constant dense<0.000000e+00> : vector<16x8xf32>
    %99 = tpu.matmul %97, %98, %cst_68 {dimension_numbers = #tpu.dot_dimension_numbers<[1], [0], [0], [1], [0, 0, 1, 1], [], []>} : vector<16x16xbf16>, vector<16x8xbf16>, vector<16x8xf32> -> vector<16x8xf32>
    %100 = arith.truncf %99 : vector<16x8xf32> to vector<16x8xbf16>
    %cst_69 = arith.constant dense<0.000000e+00> : vector<16x8xf32>
    %101 = tpu.matmul %2, %100, %cst_69 {dimension_numbers = #tpu.dot_dimension_numbers<[1], [0], [0], [1], [0, 0, 1, 1], [], []>} : vector<16x16xbf16>, vector<16x8xbf16>, vector<16x8xf32> -> vector<16x8xf32>
    %cst_70 = arith.constant 5.000000e-01 : f32
    %102 = vector.broadcast %cst_70 : f32 to vector<16x8xf32>
    %103 = arith.mulf %102, %101 : vector<16x8xf32>
    %cst_71 = arith.constant 5.000000e-01 : f32
    %104 = vector.broadcast %cst_71 : f32 to vector<16x8xf32>
    %105 = arith.mulf %104, %37 : vector<16x8xf32>
    %106 = arith.addf %103, %105 : vector<16x8xf32>
    %107 = arith.truncf %106 : vector<16x8xf32> to vector<16x8xbf16>
    %cst_72 = arith.constant dense<0.000000e+00> : vector<16x8xf32>
    %108 = tpu.matmul %2, %107, %cst_72 {dimension_numbers = #tpu.dot_dimension_numbers<[1], [0], [0], [1], [0, 0, 1, 1], [], []>} : vector<16x16xbf16>, vector<16x8xbf16>, vector<16x8xf32> -> vector<16x8xf32>
    %109 = arith.truncf %101 : vector<16x8xf32> to vector<16x8xbf16>
    %c0_73 = arith.constant 0 : index
    %c0_74 = arith.constant 0 : index
    %110 = vector.load %arg21[%c0_73, %c0_74] : memref<8x16xbf16, #tpu.memory_space<vmem>>, vector<8x16xbf16>
    %cst_75 = arith.constant dense<0.000000e+00> : vector<16x16xf32>
    %111 = tpu.matmul %109, %110, %cst_75 {dimension_numbers = #tpu.dot_dimension_numbers<[1], [0], [0], [1], [0, 0, 1, 1], [], []>} : vector<16x8xbf16>, vector<8x16xbf16>, vector<16x16xf32> -> vector<16x16xf32>
    %112 = arith.truncf %111 : vector<16x16xf32> to vector<16x16xbf16>
    %cst_76 = arith.constant dense<0.000000e+00> : vector<16x16xf32>
    %113 = tpu.matmul %2, %112, %cst_76 {dimension_numbers = #tpu.dot_dimension_numbers<[1], [0], [0], [1], [0, 0, 1, 1], [], []>} : vector<16x16xbf16>, vector<16x16xbf16>, vector<16x16xf32> -> vector<16x16xf32>
    %cst_77 = arith.constant 0.000000e+00 : f32
    %114 = vector.broadcast %cst_77 : f32 to vector<16x16xf32>
    %115 = arith.maximumf %113, %114 : vector<16x16xf32>
    %116 = arith.truncf %115 : vector<16x16xf32> to vector<16x16xbf16>
    %c0_78 = arith.constant 0 : index
    %c0_79 = arith.constant 0 : index
    %117 = vector.load %arg22[%c0_78, %c0_79] : memref<16x32xbf16, #tpu.memory_space<vmem>>, vector<16x32xbf16>
    %cst_80 = arith.constant dense<0.000000e+00> : vector<16x32xf32>
    %118 = tpu.matmul %116, %117, %cst_80 {dimension_numbers = #tpu.dot_dimension_numbers<[1], [0], [0], [1], [0, 0, 1, 1], [], []>} : vector<16x16xbf16>, vector<16x32xbf16>, vector<16x32xf32> -> vector<16x32xf32>
    %119 = arith.truncf %118 : vector<16x32xf32> to vector<16x32xbf16>
    %cst_81 = arith.constant dense<0.000000e+00> : vector<16x32xf32>
    %120 = tpu.matmul %2, %119, %cst_81 {dimension_numbers = #tpu.dot_dimension_numbers<[1], [0], [0], [1], [0, 0, 1, 1], [], []>} : vector<16x16xbf16>, vector<16x32xbf16>, vector<16x32xf32> -> vector<16x32xf32>
    %cst_82 = arith.constant 0.000000e+00 : f32
    %121 = vector.broadcast %cst_82 : f32 to vector<16x32xf32>
    %122 = arith.maximumf %120, %121 : vector<16x32xf32>
    %123 = arith.truncf %122 : vector<16x32xf32> to vector<16x32xbf16>
    %c0_83 = arith.constant 0 : index
    %c0_84 = arith.constant 0 : index
    %124 = vector.load %arg23[%c0_83, %c0_84] : memref<32x64xbf16, #tpu.memory_space<vmem>>, vector<32x64xbf16>
    %cst_85 = arith.constant dense<0.000000e+00> : vector<16x64xf32>
    %125 = tpu.matmul %123, %124, %cst_85 {dimension_numbers = #tpu.dot_dimension_numbers<[1], [0], [0], [1], [0, 0, 1, 1], [], []>} : vector<16x32xbf16>, vector<32x64xbf16>, vector<16x64xf32> -> vector<16x64xf32>
    %126 = arith.truncf %125 : vector<16x64xf32> to vector<16x64xbf16>
    %cst_86 = arith.constant dense<0.000000e+00> : vector<16x64xf32>
    %127 = tpu.matmul %2, %126, %cst_86 {dimension_numbers = #tpu.dot_dimension_numbers<[1], [0], [0], [1], [0, 0, 1, 1], [], []>} : vector<16x16xbf16>, vector<16x64xbf16>, vector<16x64xf32> -> vector<16x64xf32>
    %cst_87 = arith.constant 0.000000e+00 : f32
    %128 = vector.broadcast %cst_87 : f32 to vector<16x64xf32>
    %129 = arith.maximumf %127, %128 : vector<16x64xf32>
    %130 = arith.truncf %129 : vector<16x64xf32> to vector<16x64xbf16>
    %c0_88 = arith.constant 0 : index
    %c0_89 = arith.constant 0 : index
    %131 = vector.load %arg24[%c0_88, %c0_89] : memref<64x32xbf16, #tpu.memory_space<vmem>>, vector<64x32xbf16>
    %cst_90 = arith.constant dense<0.000000e+00> : vector<16x32xf32>
    %132 = tpu.matmul %130, %131, %cst_90 {dimension_numbers = #tpu.dot_dimension_numbers<[1], [0], [0], [1], [0, 0, 1, 1], [], []>} : vector<16x64xbf16>, vector<64x32xbf16>, vector<16x32xf32> -> vector<16x32xf32>
    %133 = arith.truncf %132 : vector<16x32xf32> to vector<16x32xbf16>
    %cst_91 = arith.constant dense<0.000000e+00> : vector<16x32xf32>
    %134 = tpu.matmul %2, %133, %cst_91 {dimension_numbers = #tpu.dot_dimension_numbers<[1], [0], [0], [1], [0, 0, 1, 1], [], []>} : vector<16x16xbf16>, vector<16x32xbf16>, vector<16x32xf32> -> vector<16x32xf32>
    %cst_92 = arith.constant 0.000000e+00 : f32
    %135 = vector.broadcast %cst_92 : f32 to vector<16x32xf32>
    %136 = arith.maximumf %134, %135 : vector<16x32xf32>
    %137 = arith.truncf %101 : vector<16x8xf32> to vector<16x8xbf16>
    %cst_93 = arith.constant dense<0.000000e+00> : vector<16x16xf32>
    %138 = tpu.matmul %137, %137, %cst_93 {dimension_numbers = #tpu.dot_dimension_numbers<[1], [1], [0], [0], [0, 0, 1, 0], [], []>} : vector<16x8xbf16>, vector<16x8xbf16>, vector<16x16xf32> -> vector<16x16xf32>
    %cst_94 = arith.constant 0.000000e+00 : f32
    %139 = vector.broadcast %cst_94 : f32 to vector<16x16xf32>
    %140 = arith.subf %139, %138 : vector<16x16xf32>
    %141 = math.exp %140 : vector<16x16xf32>
    %cst_95 = arith.constant 1.000000e+00 : f32
    %142 = vector.broadcast %cst_95 : f32 to vector<16x16xf32>
    %143 = arith.addf %142, %141 : vector<16x16xf32>
    %cst_96 = arith.constant 1.000000e+00 : f32
    %144 = vector.broadcast %cst_96 : f32 to vector<16x16xf32>
    %145 = arith.divf %144, %143 : vector<16x16xf32>
    %c0_97 = arith.constant 0 : index
    %c0_98 = arith.constant 0 : index
    %146 = vector.load %arg25[%c0_97, %c0_98] : memref<8x4xf32, #tpu.memory_space<vmem>>, vector<8x4xf32>
    %147 = arith.mulf %146, %146 : vector<8x4xf32>
    %cst_99 = arith.constant dense<0.000000e+00> : vector<4xf32>
    %148 = vector.multi_reduction <add>, %147, %cst_99 [0] : vector<8x4xf32> to vector<4xf32>
    %149 = vector.shape_cast %148 : vector<4xf32> to vector<1x4xf32>
    %150 = arith.mulf %108, %108 : vector<16x8xf32>
    %cst_100 = arith.constant dense<0.000000e+00> : vector<16xf32>
    %151 = vector.multi_reduction <add>, %150, %cst_100 [1] : vector<16x8xf32> to vector<16xf32>
    %152 = vector.shape_cast %151 : vector<16xf32> to vector<16x1xf32>
    %cst_101 = arith.constant dense<0.000000e+00> : vector<16x4xf32>
    %153 = tpu.matmul %108, %146, %cst_101 {dimension_numbers = #tpu.dot_dimension_numbers<[1], [0], [0], [1], [0, 0, 1, 1], [], []>} : vector<16x8xf32>, vector<8x4xf32>, vector<16x4xf32> -> vector<16x4xf32>
    %154 = vector.broadcast %152 : vector<16x1xf32> to vector<16x4xf32>
    %155 = vector.broadcast %149 : vector<1x4xf32> to vector<16x4xf32>
    %156 = arith.addf %154, %155 : vector<16x4xf32>
    %cst_102 = arith.constant 2.000000e+00 : f32
    %157 = vector.broadcast %cst_102 : f32 to vector<16x4xf32>
    %158 = arith.mulf %157, %153 : vector<16x4xf32>
    %159 = arith.subf %156, %158 : vector<16x4xf32>
    %cst_103 = arith.constant 0.000000e+00 : f32
    %160 = vector.broadcast %cst_103 : f32 to vector<16x4xf32>
    %161 = arith.maximumf %159, %160 : vector<16x4xf32>
    %cst_104 = arith.constant 1.000000e+00 : f32
    %162 = vector.broadcast %cst_104 : f32 to vector<16x4xf32>
    %163 = arith.divf %161, %162 : vector<16x4xf32>
    %cst_105 = arith.constant 1.000000e+00 : f32
    %164 = vector.broadcast %cst_105 : f32 to vector<16x4xf32>
    %165 = arith.addf %164, %163 : vector<16x4xf32>
    %cst_106 = arith.constant 1.000000e+00 : f32
    %166 = vector.broadcast %cst_106 : f32 to vector<16x4xf32>
    %167 = arith.divf %166, %165 : vector<16x4xf32>
    %cst_107 = arith.constant dense<0.000000e+00> : vector<16xf32>
    %168 = vector.multi_reduction <add>, %167, %cst_107 [1] : vector<16x4xf32> to vector<16xf32>
    %169 = vector.shape_cast %168 : vector<16xf32> to vector<16x1xf32>
    %170 = vector.broadcast %169 : vector<16x1xf32> to vector<16x4xf32>
    %171 = arith.divf %167, %170 : vector<16x4xf32>
    %172 = arith.mulf %37, %37 : vector<16x8xf32>
    %cst_108 = arith.constant dense<0.000000e+00> : vector<16xf32>
    %173 = vector.multi_reduction <add>, %172, %cst_108 [1] : vector<16x8xf32> to vector<16xf32>
    %174 = vector.shape_cast %173 : vector<16xf32> to vector<16x1xf32>
    %cst_109 = arith.constant dense<0.000000e+00> : vector<16x4xf32>
    %175 = tpu.matmul %37, %146, %cst_109 {dimension_numbers = #tpu.dot_dimension_numbers<[1], [0], [0], [1], [0, 0, 1, 1], [], []>} : vector<16x8xf32>, vector<8x4xf32>, vector<16x4xf32> -> vector<16x4xf32>
    %176 = vector.broadcast %174 : vector<16x1xf32> to vector<16x4xf32>
    %177 = vector.broadcast %149 : vector<1x4xf32> to vector<16x4xf32>
    %178 = arith.addf %176, %177 : vector<16x4xf32>
    %cst_110 = arith.constant 2.000000e+00 : f32
    %179 = vector.broadcast %cst_110 : f32 to vector<16x4xf32>
    %180 = arith.mulf %179, %175 : vector<16x4xf32>
    %181 = arith.subf %178, %180 : vector<16x4xf32>
    %cst_111 = arith.constant 0.000000e+00 : f32
    %182 = vector.broadcast %cst_111 : f32 to vector<16x4xf32>
    %183 = arith.maximumf %181, %182 : vector<16x4xf32>
    %cst_112 = arith.constant 1.000000e+00 : f32
    %184 = vector.broadcast %cst_112 : f32 to vector<16x4xf32>
    %185 = arith.divf %183, %184 : vector<16x4xf32>
    %cst_113 = arith.constant 1.000000e+00 : f32
    %186 = vector.broadcast %cst_113 : f32 to vector<16x4xf32>
    %187 = arith.addf %186, %185 : vector<16x4xf32>
    %cst_114 = arith.constant 1.000000e+00 : f32
    %188 = vector.broadcast %cst_114 : f32 to vector<16x4xf32>
    %189 = arith.divf %188, %187 : vector<16x4xf32>
    %cst_115 = arith.constant dense<0.000000e+00> : vector<16xf32>
    %190 = vector.multi_reduction <add>, %189, %cst_115 [1] : vector<16x4xf32> to vector<16xf32>
    %191 = vector.shape_cast %190 : vector<16xf32> to vector<16x1xf32>
    %192 = vector.broadcast %191 : vector<16x1xf32> to vector<16x4xf32>
    %193 = arith.divf %189, %192 : vector<16x4xf32>
    %cst_116 = arith.constant 0.000000e+00 : f32
    %194 = vector.broadcast %cst_116 : f32 to vector<16x24xf32>
    %195 = tpu.concatenate %67, %136, %37, %108, %31, %171, %193, %194 in 1 : vector<16x32xf32>, vector<16x32xf32>, vector<16x8xf32>, vector<16x8xf32>, vector<16x16xf32>, vector<16x4xf32>, vector<16x4xf32>, vector<16x24xf32> -> vector<16x128xf32>
    %c0_117 = arith.constant 0 : index
    %c0_118 = arith.constant 0 : index
    %196 = vector.load %arg26[%c0_117, %c0_118] : memref<16x128xf32, #tpu.memory_space<vmem>>, vector<16x128xf32>
    tpu.vector_store %arg26[%c0_117, %c0_118], %195 {strides = array<i32>} : memref<16x128xf32, #tpu.memory_space<vmem>>, vector<16x128xf32>,
    %c0_119 = arith.constant 0 : index
    %c0_120 = arith.constant 0 : index
    %197 = vector.load %arg27[%c0_119, %c0_120] : memref<16x16xf32, #tpu.memory_space<vmem>>, vector<16x16xf32>
    tpu.vector_store %arg27[%c0_119, %c0_120], %145 {strides = array<i32>} : memref<16x16xf32, #tpu.memory_space<vmem>>, vector<16x16xf32>,
    return
  }
}

</mosaic_0001>

<bundles_post_ra>
// kernel: tpu_custom_call.1
= control target key start
LH: loop header
LB: loop body
LE: loop exit
PB: predicated region body
PF: predicated region fallthrough
CT: control target
= control target key end

     0   :  { %s2877_s0 = inlined_call_operand.vmem [shape: f32[16,32], index: 0, kind: input, shape index: {}]   ;;  %s2878_s1 = inlined_call_operand.vmem [shape: bf16[16,16], index: 1, kind: input, shape index: {}]   ;;  %s2879_s2 = inlined_call_operand.vmem [shape: bf16[32,128], index: 2, kind: input, shape index: {}]   ;;  %s2880_s3 = inlined_call_operand.vmem [shape: f32[1,64], index: 3, kind: input, shape index: {}]   ;;  %s2881_s4 = inlined_call_operand.vmem [shape: bf16[64,32], index: 4, kind: input, shape index: {}]   ;;  %s2882_s5 = inlined_call_operand.vmem [shape: f32[1,32], index: 5, kind: input, shape index: {}]   ;;  %s2883_s6 = inlined_call_operand.vmem [shape: bf16[32,16], index: 6, kind: input, shape index: {}]   ;;  %s2884_s7 = inlined_call_operand.vmem [shape: f32[1,16], index: 7, kind: input, shape index: {}]   ;;  %s2885_s8 = inlined_call_operand.vmem [shape: bf16[16,8], index: 8, kind: input, shape index: {}]   ;;  %s2886_s9 = inlined_call_operand.vmem [shape: f32[1,8], index: 9, kind: input, shape index: {}]   ;;  %s2887_s10 = inlined_call_operand.vmem [shape: bf16[8,16], index: 10, kind: input, shape index: {}]   ;;  %s2888_s11 = inlined_call_operand.vmem [shape: f32[1,16], index: 11, kind: input, shape index: {}]   ;;  %s2889_s12 = inlined_call_operand.vmem [shape: bf16[16,32], index: 12, kind: input, shape index: {}]   ;;  %s2890_s13 = inlined_call_operand.vmem [shape: f32[1,32], index: 13, kind: input, shape index: {}]   ;;  %s2891_s14 = inlined_call_operand.vmem [shape: bf16[32,64], index: 14, kind: input, shape index: {}]   ;;  %s2892_s15 = inlined_call_operand.vmem [shape: f32[1,64], index: 15, kind: input, shape index: {}]   ;;  %s2893_s16 = inlined_call_operand.vmem [shape: bf16[64,32], index: 16, kind: input, shape index: {}]   ;;  %s2894_s17 = inlined_call_operand.vmem [shape: f32[1,32], index: 17, kind: input, shape index: {}]   ;;  %s2895_s18 = inlined_call_operand.vmem [shape: bf16[64,32], index: 18, kind: input, shape index: {}]   ;;  %s2896_s19 = inlined_call_operand.vmem [shape: bf16[32,16], index: 19, kind: input, shape index: {}]   ;;  %s2897_s20 = inlined_call_operand.vmem [shape: bf16[16,8], index: 20, kind: input, shape index: {}]   ;;  %s2898_s21 = inlined_call_operand.vmem [shape: bf16[8,16], index: 21, kind: input, shape index: {}]   ;;  %s2899_s22 = inlined_call_operand.vmem [shape: bf16[16,32], index: 22, kind: input, shape index: {}]   ;;  %s2900_s23 = inlined_call_operand.vmem [shape: bf16[32,64], index: 23, kind: input, shape index: {}]   ;;  %s2901_s24 = inlined_call_operand.vmem [shape: bf16[64,32], index: 24, kind: input, shape index: {}]   ;;  %s2902_s25 = inlined_call_operand.vmem [shape: f32[8,4], index: 25, kind: input, shape index: {}]   ;;  %s2903_s26 = inlined_call_operand.hbm [shape: f32[16,128], index: 26, kind: output, shape index: {0}]   ;;  %s2904_s27 = inlined_call_operand.hbm [shape: f32[16,16], index: 27, kind: output, shape index: {1}]  }
   0x1   :  { %2909 = sst [smem:[#allocation8_spill]] %s2877_s0 }
   0x2   :  { %2910 = sst [smem:[#allocation9_spill]] %s2878_s1 }
   0x3   :  { %2911 = sst [smem:[#allocation10_spill]] %s2879_s2 }
   0x4   :  { %2912 = sst [smem:[#allocation11_spill]] %s2880_s3 }
   0x5   :  { %2913 = sst [smem:[#allocation12_spill]] %s2881_s4 }
   0x6   :  { %2914 = sst [smem:[#allocation13_spill]] %s2882_s5 }
   0x7   :  { %2915 = sst [smem:[#allocation14_spill]] %s2883_s6 }
   0x8   :  { %2916 = sst [smem:[#allocation15_spill]] %s2884_s7 }
   0x9   :  { %2917 = sst [smem:[#allocation16_spill]] %s2885_s8 }
   0xa   :  { %2918 = sst [smem:[#allocation17_spill]] %s2886_s9 }
   0xb   :  { %2919 = sst [smem:[#allocation18_spill]] %s2887_s10 }
   0xc   :  { %2920 = sst [smem:[#allocation19_spill]] %s2888_s11 }
   0xd   :  { %33 = vsyncpa [#allocation3], 0  ;;  %s2921_s8 = sld [smem:[#allocation10_spill]]  ;;  %v2352_v1 = vmov 0.0   ;;  %vm2353_vm0 = vmmov 0   ;;  %vm109_vm1 = vcmask 261120  }
   0xe   :  { %2047 = vmatprep.subr.bf16.mxu0 %v2352_v1  ;;  %2055 = vmatprep.subr.bf16.mxu1 %v2352_v1  ;;  %s2922_s0 = sld [smem:[#allocation8_spill]] }
   0xf   :  { %2051 = vmatprep.mubr.msk.bf16.mxu0 %vm2353_vm0, %v2352_v1  ;;  %2057 = vmatprep.mubr.msk.bf16.mxu1 %vm2353_vm0, %v2352_v1 }
  0x13   :  { %v2253_v0 = vld [vmem:[%s2921_s8 + $0x8] sm:$0xff]   ;;  %v2254_v2 = vld [vmem:[%s2921_s8] sm:$0xff]  }
  0x14   :  { %2048 = vmatpush3.bf16.msra.mxu0 %v2253_v0  ;;  %v88_v3 = vld [vmem:[%s2922_s0] sm:$0xff]  ;;  %v89_v4 = vld [vmem:[%s2922_s0 + $0x8] sm:$0xff] }
  0x15   :  { %2049 = vmatprep.subr.bf16.mxu0 %v2352_v1  ;;  %v90_v5 = vpack.c.bf16 %v89_v4, %v88_v3 }
  0x18   :  { %2050 = vmatpush3.bf16.msra.mxu0 %v2254_v2 }
  0x19   :  { %2073 = vmatprep.subr.bf16.mxu0 %v2352_v1 }
  0x1b   :  { %2052 = vmatmul.mubr.msk.bf16.vlgmr.msra.gmra.mxu0 %vm109_vm1, %v90_v5 }
  0x1c   :  { %2077 = vmatprep.mubr.msk.bf16.mxu0 %vm2353_vm0, %v2352_v1 }
  0x1d   :  { %34 = vsyncpa [#allocation5], 0  ;;  %s2923_s11 = sld [smem:[#allocation11_spill]]  ;;  %s2354_s2 = smov 64   ;;  %vm175_vm2 = vcmask 130048   ;;  %vm262_vm3 = vcmask 523264  }
  0x1e   :  { %s2924_s4 = sld [smem:[#allocation9_spill]]  ;;  %vm452_vm4 = vcmask 1043456   ;;  %vm448_vm5 = vcmask 64512   ;;  %vm1573_vm6 = vcmask 31744  }
  0x1f   :  { %s2925_s9 = sld [smem:[#allocation12_spill]] }
  0x20   :  { %s2926_s3 = sld [smem:[#allocation14_spill]] }
  0x21   :  { %s2928_s0 = sld [smem:[#allocation16_spill]] }
  0x22   :  { %s2929_s1 = sld [smem:[#allocation15_spill]] }
  0x23   :  { %v1909_v7 = vld [vmem:[%s2923_s11] ss:$0 sm:$0xff]  ;;  %s2931_s8 = sld [smem:[#allocation17_spill]] }
  0x24   :  { %v2534_v18 = vld [vmem:[%s2924_s4] sm:$0xff]  }
  0x25   :  { %v2256_v19 = vld [vmem:[%s2925_s9 + $0x18] sm:$0xff]   ;;  %v2257_v20 = vld [vmem:[%s2925_s9 + $0x10] sm:$0xff]   ;;  %v2258_v21 = vld [vmem:[%s2925_s9 + $0x8] sm:$0xff]  }
  0x26   :  { %v2259_v22 = vld [vmem:[%s2925_s9] sm:$0xff]   ;;  %v2260_v23 = vld [vmem:[%s2926_s3 + $0x8] sm:$0xff]   ;;  %s2927_s9 = sld [smem:[#allocation13_spill]] }
  0x27   :  { %2074 = vmatpush3.bf16.msra.mxu0 %v2260_v23  ;;  %v2261_v24 = vld [vmem:[%s2926_s3] sm:$0xff]   ;;  %s2930_s3 = sld [smem:[#allocation18_spill]] }
  0x28   :  { %2075 = vmatprep.subr.bf16.mxu0 %v2352_v1  ;;  %v2262_v48 = vld [vmem:[%s2928_s0] sm:$0xff]   ;;  %s2932_s0 = sld [smem:[#allocation19_spill]] }
  0x29   :  { %v1918_v49 = vld [vmem:[%s2929_s1] ss:$0 sm:$0xff] }
  0x2a   :  { %v1922_v61 = vld [vmem:[%s2931_s8] ss:$0 sm:$0xff]  ;;  %s2356_s8 = smov 80  }
  0x2b   :  { %2076 = vmatpush3.bf16.msra.mxu0 %v2261_v24  ;;  %v1927_v23 = vld [vmem:[%s2890_s13] ss:$0 sm:$0xff] }
  0x2c   :  { %2081 = vmatprep.subr.bf16.mxu0 %v2352_v1  ;;  %v1912_v38 = vld [vmem:[%s2927_s9] ss:$0 sm:$0xff] }
  0x2d   :  { %v440_v59 = vld [vmem:[%s2930_s3] sm:$0xf] }
  0x2e   :  { %v454_v60 = vsel %vm452_vm4, %v440_v59, 0 }
  0xdb   :  { %v147_v6 = vpop.f32.mrf.mxu0 }
  0xdc   :  { %v161_v9 = vadd.f32 %v1909_v7, %v147_v6 }
  0xdd   :  { %v2053_v8 = vpop.f32.mrf.mxu0 }
  0xde   :  { %v163_v14 = vmax.f32 %v161_v9, 0.0  ;;  %v2263_v8 = vld [vmem:[%s2889_s12] sm:$0xff]  }
  0xdf   :  { %v150_v10 = vpop.f32.mrf.mxu0  ;;  %v1925_v9 = vld [vmem:[%s2932_s0] ss:$0 sm:$0xff] }
  0xe0   :  { %v162_v11 = vadd.f32 %v1909_v7, %v150_v10  ;;  %v165_v12 = vpack.c.bf16 %v150_v10, %v147_v6  ;;  %v717_v28 = vmul.f32 0.5, %v163_v14 }
  0xe1   :  { %v2054_v13 = vpop.f32.mrf.mxu0 }
  0xe2   :  { %v164_v15 = vmax.f32 %v162_v11, 0.0  ;;  %172 = vrot.lane.b32.xlu0 %v165_v12, %s2354_s2 }
  0xe4   :  { %v222_v16 = vpack.c.bf16 %v164_v15, %v163_v14  ;;  %v718_v34 = vmul.f32 0.5, %v164_v15 }
 0x154   :  { %v173_v17 = vpop.permute.xlu0 %172 }
 0x155   :  { %2056 = vmatpush3.bf16.msra.mxu1 %v173_v17 }
 0x156   :  { %2061 = vmatprep.subr.bf16.mxu1 %v2352_v1 }
 0x158   :  { %2058 = vmatmul.mubr.msk.bf16.vlgmr.msra.gmra.mxu1 %vm175_vm2, %v2534_v18 }
 0x159   :  { %2062 = vmatpush3.bf16.msra.mxu1 %v2256_v19  ;;  %2069 = vmatprep.mubr.msk.bf16.mxu1 %vm2353_vm0, %v2352_v1 }
 0x15a   :  { %2063 = vmatprep.subr.bf16.mxu1 %v2352_v1 }
 0x15d   :  { %2064 = vmatpush3.bf16.msra.mxu1 %v2257_v20  ;;  %v2264_v20 = vld [vmem:[%s2891_s14 + $0x8] sm:$0xff]  }
 0x15e   :  { %2065 = vmatprep.subr.bf16.mxu1 %v2352_v1 }
 0x161   :  { %2066 = vmatpush3.bf16.msra.mxu1 %v2258_v21  ;;  %v2265_v21 = vld [vmem:[%s2891_s14] sm:$0xff]  }
 0x162   :  { %2067 = vmatprep.subr.bf16.mxu1 %v2352_v1 }
 0x165   :  { %2068 = vmatpush3.bf16.msra.mxu1 %v2259_v22  ;;  %v2270_v22 = vld [vmem:[%s2893_s16 + $0x18] sm:$0xff]  }
 0x166   :  { %2087 = vmatprep.subr.bf16.mxu1 %v2352_v1 }
 0x168   :  { %2070 = vmatmul.mubr.msk.bf16.vlgmr.msra.gmra.mxu1 %vm262_vm3, %v222_v16 }
 0x169   :  { %2089 = vmatprep.mubr.msk.bf16.mxu1 %vm2353_vm0, %v2352_v1  ;;  %2088 = vmatpush3.bf16.msra.mxu1 %v454_v60 }
 0x16a   :  { %2099 = vmatprep.subr.bf16.mxu1 %v2352_v1 }
 0x218   :  { %v213_v25 = vpop.f32.mrf.mxu1 }
 0x219   :  { %v220_v26 = vmax.f32 %v213_v25, 0.0 }
 0x21a   :  { %v2059_v27 = vpop.f32.mrf.mxu1 }
 0x21b   :  { %v715_v29 = vmul.f32 0.5, %v220_v26 }
 0x21c   :  { %v216_v30 = vpop.f32.mrf.mxu1 }
 0x21d   :  { %v2568_v31 = vadd.f32 %v717_v28, %v715_v29  ;;  %v221_v32 = vmax.f32 %v216_v30, 0.0 }
 0x21e   :  { %v2060_v33 = vpop.f32.mrf.mxu1 }
 0x21f   :  { %v716_v35 = vmul.f32 0.5, %v221_v32  ;;  %v2266_v33 = vld [vmem:[%s2895_s18 + $0x18] sm:$0xff]  }
 0x221   :  { %v2570_v36 = vadd.f32 %v718_v34, %v716_v35  ;;  %v2267_v35 = vld [vmem:[%s2895_s18 + $0x10] sm:$0xff]  }
 0x223   :  { %v721_v37 = vpack.c.bf16 %v2570_v36, %v2568_v31  ;;  %v2273_v31 = vld [vmem:[%s2893_s16] sm:$0xff]  }
 0x224   :  { %v1930_v36 = vld [vmem:[%s2892_s15] ss:$0 sm:$0xff] }
 0x228   :  { %v300_v39 = vpop.f32.mrf.mxu1 }
 0x229   :  { %v2577_v41 = vadd.f32 %v1912_v38, %v300_v39  ;;  %v2269_v39 = vld [vmem:[%s2895_s18] sm:$0xff]  }
 0x22a   :  { %v2071_v40 = vpop.f32.mrf.mxu1 }
 0x22b   :  { %v307_v45 = vmax.f32 %v2577_v41, 0.0  ;;  %v2271_v40 = vld [vmem:[%s2893_s16 + $0x10] sm:$0xff]   ;;  %v2276_v41 = vld [vmem:[%s2897_s20] sm:$0xff]  }
 0x22c   :  { %v303_v42 = vpop.f32.mrf.mxu1 }
 0x22d   :  { %v2579_v43 = vadd.f32 %v1912_v38, %v303_v42  ;;  %v2268_v38 = vld [vmem:[%s2895_s18 + $0x8] sm:$0xff]  }
 0x22e   :  { %v2072_v44 = vpop.f32.mrf.mxu1  ;;  %v2272_v42 = vld [vmem:[%s2893_s16 + $0x8] sm:$0xff]   ;;  %s2360_s16 = smov [#allocation4]  }
 0x22f   :  { %v308_v46 = vmax.f32 %v2579_v43, 0.0  ;;  %s1891_s3 = sshll.u32 %s2360_s16, 4  ;;  %s1892_s3 = int_to_ptr.vmem [resolvable:$true] %s1891_s3 }
 0x230   :  { %s2308_s7 = scalar_lea.vmem %s1892_s3, 256  ;;  %p2313_p1 = scmp.lt.s32.totalorder %s1892_s3, %s1892_s3 }
 0x231   :  { %v309_v47 = vpack.c.bf16 %v308_v46, %v307_v45  ;;  %p2309_p0 = scmp.ne.s32.totalorder %s1892_s3, %s2308_s7  ;;  %p2314_p2 = scmp.lt.s32.totalorder %s2308_s7, %s2308_s7 }
 0x233   :  { %2078 = vmatmul.mubr.msk.bf16.vlgmr.msra.gmra.mxu0 %vm109_vm1, %v309_v47  ;;  %p2315_p3 = por %p2314_p2, %p2313_p1 }
 0x234   :  { %2083 = vmatprep.mubr.msk.bf16.mxu0 %vm2353_vm0, %v2352_v1  ;;  %2082 = vmatpush3.bf16.msra.mxu0 %v2262_v48 }
 0x235   :  { %2093 = vmatprep.subr.bf16.mxu0 %v2352_v1  ;;  %p2316_p4 = pnand %p2315_p3, %p2309_p0 }
 0x2f3   :  { %v370_v50 = vpop.f32.mrf.mxu0 }
 0x2f4   :  { %v371_v52 = vadd.f32 %v1918_v49, %v370_v50 }
 0x2f5   :  { %v2079_v51 = vpop.f32.mrf.mxu0 }
 0x2f6   :  { %v2597_v56 = vmax.f32 %v371_v52, 0.0 }
 0x2f7   :  { %v373_v53 = vpop.f32.mrf.mxu0 }
 0x2f8   :  { %v374_v54 = vadd.f32 %v1918_v49, %v373_v53 }
 0x2f9   :  { %v2080_v55 = vpop.f32.mrf.mxu0 }
 0x2fa   :  { %v2599_v57 = vmax.f32 %v374_v54, 0.0 }
 0x2fc   :  { %v379_v58 = vpack.c.bf16 %v2599_v57, %v2597_v56 }
 0x2fe   :  { %2084 = vmatmul.mubr.msk.bf16.vlgmr.msra.gmra.mxu0 %vm175_vm2, %v379_v58 }
 0x2ff   :  { %2095 = vmatprep.mubr.msk.bf16.mxu0 %vm2353_vm0, %v2352_v1  ;;  %2094 = vmatpush3.bf16.msra.mxu0 %v2263_v8 }
 0x300   :  { %2107 = vmatprep.subr.bf16.mxu0 %v2352_v1 }
 0x3be   :  { %v432_v62 = vpop.f32.mrf.mxu0 }
 0x3bf   :  { %v2614_v63 = vadd.f32 %v1922_v61, %v432_v62  ;;  %v2275_v62 = vld [vmem:[%s2896_s19] sm:$0xff]  }
 0x3c0   :  { %v2085_v0 = vpop.f32.mrf.mxu0 }
 0x3c1   :  { %v1694_v2 = vmul.f32 %v2614_v63, %v2614_v63 }
 0x3c2   :  { %v435_v3 = vpop.f32.mrf.mxu0 }
 0x3c3   :  { %v2618_v4 = vadd.f32 %v1922_v61, %v435_v3  ;;  %v1696_v5 = vsel %vm448_vm5, %v1694_v2, 0.0  ;;  %v2274_v61 = vld [vmem:[%s2896_s19 + $0x8] sm:$0xff]  }
 0x3c4   :  { %1697 = vadd.xlane.f32.xlu1 %v1696_v5  ;;  %v2086_v6 = vpop.f32.mrf.mxu0 }
 0x3c5   :  { %v439_v7 = vpack.c.bf16 %v2618_v4, %v2614_v63 }
 0x3c7   :  { %2090 = vmatmul.mubr.msk.bf16.vlgmr.msra.gmra.mxu1 %vm448_vm5, %v439_v7 }
 0x3c8   :  { %2103 = vmatprep.mubr.msk.bf16.mxu1 %vm2353_vm0, %v2352_v1  ;;  %2100 = vmatpush3.bf16.msra.mxu1 %v2264_v20 }
 0x3c9   :  { %2101 = vmatprep.subr.bf16.mxu1 %v2352_v1 }
 0x3cc   :  { %2102 = vmatpush3.bf16.msra.mxu1 %v2265_v21 }
 0x3cd   :  { %2119 = vmatprep.subr.bf16.mxu1 %v2352_v1 }
 0x487   :  { %v490_v10 = vpop.f32.mrf.mxu1 }
 0x488   :  { %v491_v12 = vadd.f32 %v1925_v9, %v490_v10 }
 0x489   :  { %v2091_v11 = vpop.f32.mrf.mxu1 }
 0x48a   :  { %v497_v16 = vmax.f32 %v491_v12, 0.0 }
 0x48b   :  { %v493_v13 = vpop.f32.mrf.mxu1 }
 0x48c   :  { %v494_v14 = vadd.f32 %v1925_v9, %v493_v13  ;;  %v844_v13 = vmul.f32 0.5, %v307_v45 }
 0x48d   :  { %v2092_v15 = vpop.f32.mrf.mxu1 }
 0x48e   :  { %v498_v17 = vmax.f32 %v494_v14, 0.0  ;;  %v845_v14 = vmul.f32 0.5, %v308_v46 }
 0x490   :  { %v499_v19 = vpack.c.bf16 %v498_v17, %v497_v16 }
 0x492   :  { %2096 = vmatmul.mubr.msk.bf16.vlgmr.msra.gmra.mxu0 %vm175_vm2, %v499_v19 }
 0x493   :  { %2115 = vmatprep.mubr.msk.bf16.mxu0 %vm2353_vm0, %v2352_v1  ;;  %2108 = vmatpush3.bf16.msra.mxu0 %v2270_v22 }
 0x494   :  { %2109 = vmatprep.subr.bf16.mxu0 %v2352_v1 }
 0x497   :  { %2110 = vmatpush3.bf16.msra.mxu0 %v2271_v40 }
 0x498   :  { %2111 = vmatprep.subr.bf16.mxu0 %v2352_v1 }
 0x49b   :  { %2112 = vmatpush3.bf16.msra.mxu0 %v2272_v42 }
 0x49c   :  { %2113 = vmatprep.subr.bf16.mxu0 %v2352_v1 }
 0x49f   :  { %2114 = vmatpush3.bf16.msra.mxu0 %v2273_v31 }
 0x4a0   :  { %2131 = vmatprep.subr.bf16.mxu0 %v2352_v1 }
 0x552   :  { %v552_v24 = vpop.f32.mrf.mxu0 }
 0x553   :  { %v553_v26 = vadd.f32 %v1927_v23, %v552_v24 }
 0x554   :  { %v2097_v25 = vpop.f32.mrf.mxu0 }
 0x555   :  { %v559_v30 = vmax.f32 %v553_v26, 0.0 }
 0x556   :  { %v555_v27 = vpop.f32.mrf.mxu0 }
 0x557   :  { %v556_v28 = vadd.f32 %v1927_v23, %v555_v27 }
 0x558   :  { %v2098_v29 = vpop.f32.mrf.mxu0 }
 0x559   :  { %v560_v32 = vmax.f32 %v556_v28, 0.0  ;;  %v955_v29 = vmul.f32 0.5, %v2597_v56 }
 0x55b   :  { %v561_v34 = vpack.c.bf16 %v560_v32, %v559_v30  ;;  %v956_v32 = vmul.f32 0.5, %v2599_v57 }
 0x55d   :  { %2104 = vmatmul.mubr.msk.bf16.vlgmr.msra.gmra.mxu1 %vm109_vm1, %v561_v34 }
 0x55e   :  { %2120 = vmatpush3.bf16.msra.mxu1 %v2266_v33  ;;  %2127 = vmatprep.mubr.msk.bf16.mxu1 %vm2353_vm0, %v2352_v1 }
 0x55f   :  { %2121 = vmatprep.subr.bf16.mxu1 %v2352_v1 }
 0x562   :  { %2122 = vmatpush3.bf16.msra.mxu1 %v2267_v35 }
 0x563   :  { %2123 = vmatprep.subr.bf16.mxu1 %v2352_v1 }
 0x566   :  { %2124 = vmatpush3.bf16.msra.mxu1 %v2268_v38 }
 0x567   :  { %2125 = vmatprep.subr.bf16.mxu1 %v2352_v1 }
 0x56a   :  { %2126 = vmatpush3.bf16.msra.mxu1 %v2269_v39 }
 0x56b   :  { %2137 = vmatprep.subr.bf16.mxu1 %v2352_v1 }
 0x56d   :  { %2128 = vmatmul.mubr.msk.bf16.vlgmr.msra.gmra.mxu1 %vm262_vm3, %v721_v37 }
 0x56e   :  { %2141 = vmatprep.mubr.msk.bf16.mxu1 %vm2353_vm0, %v2352_v1  ;;  %2138 = vmatpush3.bf16.msra.mxu1 %v2274_v61 }
 0x56f   :  { %2139 = vmatprep.subr.bf16.mxu1 %v2352_v1 }
 0x572   :  { %2140 = vmatpush3.bf16.msra.mxu1 %v2275_v62 }
 0x573   :  { %2151 = vmatprep.subr.bf16.mxu1 %v2352_v1 }
 0x61d   :  { %v622_v37 = vpop.f32.mrf.mxu1 }
 0x61e   :  { %v623_v47 = vadd.f32 %v1930_v36, %v622_v37 }
 0x61f   :  { %v2105_v44 = vpop.f32.mrf.mxu1 }
 0x620   :  { %v629_v51 = vmax.f32 %v623_v47, 0.0 }
 0x621   :  { %v625_v48 = vpop.f32.mrf.mxu1 }
 0x622   :  { %v626_v49 = vadd.f32 %v1930_v36, %v625_v48  ;;  %v1103_v36 = vld [vmem:[%s2898_s21] sm:$0xf]  ;;  %s2355_s21 = smov 72  }
 0x623   :  { %v2106_v50 = vpop.f32.mrf.mxu1  ;;  %v1108_v37 = vsel %vm452_vm4, %v1103_v36, 0 }
 0x624   :  { %v630_v52 = vmax.f32 %v626_v49, 0.0  ;;  %v1056_v50 = vmul.f32 0.5, %v2614_v63 }
 0x626   :  { %v631_v53 = vpack.c.bf16 %v630_v52, %v629_v51  ;;  %v1057_v52 = vmul.f32 0.5, %v2618_v4 }
 0x628   :  { %2116 = vmatmul.mubr.msk.bf16.vlgmr.msra.gmra.mxu0 %vm262_vm3, %v631_v53 }
 0x629   :  { %2133 = vmatprep.mubr.msk.bf16.mxu0 %vm2353_vm0, %v2352_v1 }
 0x62d   :  { %v791_v54 = vpop.f32.mrf.mxu1 }
 0x62f   :  { %v2129_v55 = vpop.f32.mrf.mxu1 }
 0x631   :  { %v794_v58 = vpop.f32.mrf.mxu1 }
 0x632   :  { %v798_v59 = vpack.c.bf16 %v794_v58, %v791_v54 }
 0x633   :  { %v2130_v60 = vpop.f32.mrf.mxu1 }
 0x634   :  { %2132 = vmatpush3.bf16.msra.mxu0 %v798_v59 }
 0x635   :  { %2145 = vmatprep.subr.bf16.mxu0 %v2352_v1 }
 0x637   :  { %2134 = vmatmul.mubr.msk.bf16.vlgmr.msra.gmra.mxu0 %vm175_vm2, %v2534_v18 }
 0x638   :  { %2147 = vmatprep.mubr.msk.bf16.mxu0 %vm2353_vm0, %v2352_v1 }
 0x6e8   :  { %v2707_v0 = vpop.f32.mrf.mxu0 }
 0x6ea   :  { %v2117_v2 = vpop.f32.mrf.mxu0 }
 0x6ec   :  { %v2709_v3 = vpop.f32.mrf.mxu0 }
 0x6ee   :  { %v2118_v5 = vpop.f32.mrf.mxu0 }
 0x6f7   :  { %v833_v6 = vpop.f32.mrf.mxu0 }
 0x6f8   :  { %v840_v7 = vmax.f32 %v833_v6, 0.0 }
 0x6f9   :  { %v2135_v8 = vpop.f32.mrf.mxu0 }
 0x6fa   :  { %v842_v10 = vmul.f32 0.5, %v840_v7 }
 0x6fb   :  { %v836_v9 = vpop.f32.mrf.mxu0 }
 0x6fc   :  { %v841_v11 = vmax.f32 %v836_v9, 0.0  ;;  %v846_v16 = vadd.f32 %v844_v13, %v842_v10 }
 0x6fd   :  { %v2136_v12 = vpop.f32.mrf.mxu0 }
 0x6fe   :  { %v843_v15 = vmul.f32 0.5, %v841_v11 }
 0x700   :  { %v847_v17 = vadd.f32 %v845_v14, %v843_v15  ;;  %v1695_v14 = vmul.f32 %v2618_v4, %v2618_v4 }
 0x702   :  { %v848_v19 = vpack.c.bf16 %v847_v17, %v846_v16  ;;  %v1699_v15 = vsel %vm448_vm5, %v1695_v14, 0.0  ;;  %v2277_v16 = vld [vmem:[%s2899_s22] sm:$0xff]  }
 0x704   :  { %2142 = vmatmul.mubr.msk.bf16.vlgmr.msra.gmra.mxu1 %vm109_vm1, %v848_v19 }
 0x705   :  { %2153 = vmatprep.mubr.msk.bf16.mxu1 %vm2353_vm0, %v2352_v1  ;;  %2152 = vmatpush3.bf16.msra.mxu1 %v2276_v41 }
 0x706   :  { %2163 = vmatprep.subr.bf16.mxu1 %v2352_v1 }
 0x7c4   :  { %v902_v20 = vpop.f32.mrf.mxu1 }
 0x7c6   :  { %v2143_v21 = vpop.f32.mrf.mxu1 }
 0x7c8   :  { %v905_v22 = vpop.f32.mrf.mxu1 }
 0x7c9   :  { %v909_v23 = vpack.c.bf16 %v905_v22, %v902_v20 }
 0x7ca   :  { %v2144_v24 = vpop.f32.mrf.mxu1 }
 0x7cb   :  { %2146 = vmatpush3.bf16.msra.mxu0 %v909_v23 }
 0x7cc   :  { %2157 = vmatprep.subr.bf16.mxu0 %v2352_v1 }
 0x7ce   :  { %2148 = vmatmul.mubr.msk.bf16.vlgmr.msra.gmra.mxu0 %vm175_vm2, %v2534_v18 }
 0x7cf   :  { %2159 = vmatprep.mubr.msk.bf16.mxu0 %vm2353_vm0, %v2352_v1 }
 0x88e   :  { %v944_v43 = vpop.f32.mrf.mxu0 }
 0x88f   :  { %v951_v45 = vmax.f32 %v944_v43, 0.0 }
 0x890   :  { %v2149_v46 = vpop.f32.mrf.mxu0 }
 0x891   :  { %v953_v26 = vmul.f32 0.5, %v951_v45 }
 0x892   :  { %v947_v25 = vpop.f32.mrf.mxu0 }
 0x893   :  { %v952_v27 = vmax.f32 %v947_v25, 0.0  ;;  %v957_v33 = vadd.f32 %v955_v29, %v953_v26  ;;  %v2278_v25 = vld [vmem:[%s2900_s23 + $0x8] sm:$0xff]   ;;  %v2279_v26 = vld [vmem:[%s2900_s23] sm:$0xff]  }
 0x894   :  { %v2150_v28 = vpop.f32.mrf.mxu0 }
 0x895   :  { %v954_v30 = vmul.f32 0.5, %v952_v27 }
 0x897   :  { %v958_v34 = vadd.f32 %v956_v32, %v954_v30 }
 0x899   :  { %v959_v35 = vpack.c.bf16 %v958_v34, %v957_v33 }
 0x89b   :  { %2154 = vmatmul.mubr.msk.bf16.vlgmr.msra.gmra.mxu1 %vm175_vm2, %v959_v35  ;;  %v2280_v35 = vld [vmem:[%s2901_s24 + $0x18] sm:$0xff]  }
 0x89c   :  { %2165 = vmatprep.mubr.msk.bf16.mxu1 %vm2353_vm0, %v2352_v1 }
 0x95b   :  { %v1005_v38 = vpop.f32.mrf.mxu1 }
 0x95d   :  { %v2155_v39 = vpop.f32.mrf.mxu1 }
 0x95f   :  { %v1008_v40 = vpop.f32.mrf.mxu1 }
 0x960   :  { %v1012_v42 = vpack.c.bf16 %v1008_v40, %v1005_v38  ;;  %v2281_v38 = vld [vmem:[%s2901_s24 + $0x10] sm:$0xff]  }
 0x961   :  { %v2156_v31 = vpop.f32.mrf.mxu1 }
 0x962   :  { %2158 = vmatpush3.bf16.msra.mxu0 %v1012_v42 }
 0x963   :  { %2169 = vmatprep.subr.bf16.mxu0 %v2352_v1 }
 0x965   :  { %2160 = vmatmul.mubr.msk.bf16.vlgmr.msra.gmra.mxu0 %vm175_vm2, %v2534_v18 }
 0x966   :  { %2171 = vmatprep.mubr.msk.bf16.mxu0 %vm2353_vm0, %v2352_v1  ;;  %2170 = vmatpush3.bf16.msra.mxu0 %v1108_v37  ;;  %v2282_v37 = vld [vmem:[%s2901_s24 + $0x8] sm:$0xff]  }
 0x967   :  { %2181 = vmatprep.subr.bf16.mxu0 %v2352_v1 }
 0xa25   :  { %v1047_v44 = vpop.f32.mrf.mxu0 }
 0xa26   :  { %v1054_v48 = vmul.f32 0.5, %v1047_v44 }
 0xa27   :  { %v2161_v47 = vpop.f32.mrf.mxu0 }
 0xa28   :  { %v1058_v55 = vadd.f32 %v1056_v50, %v1054_v48  ;;  %v1571_v47 = vld [vmem:[%s2902_s25] sm:$0xff]  ;;  %s2358_s25 = smov 96  }
 0xa29   :  { %v1050_v49 = vpop.f32.mrf.mxu0 }
 0xa2a   :  { %v1055_v51 = vmul.f32 0.5, %v1050_v49  ;;  %v2744_v53 = vpack.c.bf16 %v1050_v49, %v1047_v44  ;;  %v2283_v44 = vld [vmem:[%s2901_s24] sm:$0xff]   ;;  %s2357_s24 = smov 32  }
 0xa2b   :  { %v2162_v54 = vpop.f32.mrf.mxu0 }
 0xa2c   :  { %v1059_v58 = vadd.f32 %v1057_v52, %v1055_v51  ;;  %2172 = vmatmul.mubr.msk.bf16.vlgmr.msra.gmra.mxu0 %vm448_vm5, %v2744_v53 }
 0xa2d   :  { %2183 = vmatprep.mubr.msk.bf16.mxu0 %vm2353_vm0, %v2352_v1  ;;  %2182 = vmatpush3.bf16.msra.mxu0 %v2277_v16 }
 0xa2e   :  { %v1060_v59 = vpack.c.bf16 %v1059_v58, %v1058_v55  ;;  %2193 = vmatprep.subr.bf16.mxu0 %v2352_v1  ;;  %v1572_v58 = vmul.f32 %v1571_v47, %v1571_v47 }
 0xa30   :  { %2164 = vmatpush3.bf16.msra.mxu1 %v1060_v59  ;;  %v1574_v59 = vsel %vm1573_vm6, %v1572_v58, 0.0 }
 0xa31   :  { %2175 = vmatprep.subr.bf16.mxu1 %v2352_v1 }
 0xa33   :  { %2166 = vmatmul.mubr.msk.bf16.vlgmr.msra.gmra.mxu1 %vm175_vm2, %v2534_v18 }
 0xa34   :  { %2177 = vmatprep.mubr.msk.bf16.mxu1 %vm2353_vm0, %v2352_v1 }
 0xaec   :  { %v1144_v60 = vpop.f32.mrf.mxu0 }
 0xaee   :  { %v2173_v61 = vpop.f32.mrf.mxu0 }
 0xaf0   :  { %v1147_v62 = vpop.f32.mrf.mxu0 }
 0xaf1   :  { %v1151_v2 = vpack.c.bf16 %v1147_v62, %v1144_v60  ;;  %v1575_v60 = vrot.slane %v1574_v59, 4 }
 0xaf2   :  { %v2174_v5 = vpop.f32.mrf.mxu0 }
 0xaf3   :  { %v2755_v6 = vpop.f32.mrf.mxu1  ;;  %2176 = vmatpush3.bf16.msra.mxu1 %v1151_v2  ;;  %v1576_v61 = vadd.f32 %v1575_v60, %v1574_v59  ;;  %v1698_v5 = vpop.xlane.xlu1 %1697 }
 0xaf4   :  { %v1581_v7 = vmul.f32 %v2755_v6, %v2755_v6  ;;  %2187 = vmatprep.subr.bf16.mxu1 %v2352_v1 }
 0xaf5   :  { %v2167_v8 = vpop.f32.mrf.mxu1  ;;  %v1577_v62 = vrot.slane %v1576_v61, 2 }
 0xaf6   :  { %2178 = vmatmul.mubr.msk.bf16.vlgmr.msra.gmra.mxu1 %vm175_vm2, %v2534_v18  ;;  %v1583_v9 = vsel %vm448_vm5, %v1581_v7, 0.0 }
 0xaf7   :  { %1584 = vadd.xlane.f32.xlu0 %v1583_v9  ;;  %v2763_v10 = vpop.f32.mrf.mxu1  ;;  %2189 = vmatprep.mubr.msk.bf16.mxu1 %vm2353_vm0, %v2352_v1  ;;  %v1578_v2 = vadd.f32 %v1577_v62, %v1576_v61 }
 0xaf8   :  { %v1582_v11 = vmul.f32 %v2763_v10, %v2763_v10 }
 0xaf9   :  { %v2168_v12 = vpop.f32.mrf.mxu1  ;;  %v1579_v9 = vrot.slane %v1578_v2, 1 }
 0xafa   :  { %v1586_v13 = vsel %vm448_vm5, %v1582_v11, 0.0 }
 0xafb   :  { %1587 = vadd.xlane.f32.xlu1 %v1586_v13  ;;  %v1580_v14 = vadd.f32 %v1579_v9, %v1578_v2 }
 0xaff   :  { %1700 = vadd.xlane.f32.xlu1 %v1699_v15 }
 0xb0d   :  { %1823 = vrot.lane.b32.xlu0 %v2763_v10, %s2355_s21 }
 0xb11   :  { %1831 = vrot.lane.b32.xlu0 %v2599_v57, %s2356_s8 }
 0xb80   :  { %v1585_v16 = vpop.xlane.xlu0 %1584 }
 0xbb6   :  { %v1186_v17 = vpop.f32.mrf.mxu1 }
 0xbb7   :  { %v1193_v21 = vmax.f32 %v1186_v17, 0.0 }
 0xbb8   :  { %v2179_v19 = vpop.f32.mrf.mxu1 }
 0xbba   :  { %v1189_v20 = vpop.f32.mrf.mxu1 }
 0xbbb   :  { %v1194_v22 = vmax.f32 %v1189_v20, 0.0 }
 0xbbc   :  { %v2180_v23 = vpop.f32.mrf.mxu1 }
 0xbbd   :  { %v1195_v24 = vpack.c.bf16 %v1194_v22, %v1193_v21  ;;  %v1105_v22 = vsel %vm448_vm5, %v2744_v53, 0  ;;  %v1670_v23 = vadd.f32 %v1585_v16, %v1580_v14 }
 0xbbf   :  { %2184 = vmatmul.mubr.msk.bf16.vlgmr.msra.gmra.mxu0 %vm175_vm2, %v1195_v24 }
 0xbc0   :  { %2197 = vmatprep.mubr.msk.bf16.mxu0 %vm2353_vm0, %v2352_v1  ;;  %2194 = vmatpush3.bf16.msra.mxu0 %v2278_v25 }
 0xbc1   :  { %2195 = vmatprep.subr.bf16.mxu0 %v2352_v1 }
 0xbc4   :  { %2196 = vmatpush3.bf16.msra.mxu0 %v2279_v26  ;;  %v1783_v26 = vadd.f32 %v1698_v5, %v1580_v14 }
 0xbc5   :  { %2207 = vmatprep.subr.bf16.mxu0 %v2352_v1 }
 0xc7f   :  { %v1241_v57 = vpop.f32.mrf.mxu0 }
 0xc81   :  { %v2185_v41 = vpop.f32.mrf.mxu0 }
 0xc83   :  { %v1244_v43 = vpop.f32.mrf.mxu0 }
 0xc84   :  { %v1248_v45 = vpack.c.bf16 %v1244_v43, %v1241_v57 }
 0xc85   :  { %v2186_v46 = vpop.f32.mrf.mxu0 }
 0xc86   :  { %2188 = vmatpush3.bf16.msra.mxu1 %v1248_v45 }
 0xc87   :  { %2201 = vmatprep.subr.bf16.mxu1 %v2352_v1 }
 0xc89   :  { %2190 = vmatmul.mubr.msk.bf16.vlgmr.msra.gmra.mxu1 %vm175_vm2, %v2534_v18 }
 0xc8a   :  { %2203 = vmatprep.mubr.msk.bf16.mxu1 %vm2353_vm0, %v2352_v1 }
 0xd49   :  { %v1283_v27 = vpop.f32.mrf.mxu1 }
 0xd4a   :  { %v1290_v30 = vmax.f32 %v1283_v27, 0.0 }
 0xd4b   :  { %v2191_v28 = vpop.f32.mrf.mxu1 }
 0xd4d   :  { %v1286_v29 = vpop.f32.mrf.mxu1 }
 0xd4e   :  { %v1291_v32 = vmax.f32 %v1286_v29, 0.0 }
 0xd4f   :  { %v2192_v33 = vpop.f32.mrf.mxu1 }
 0xd50   :  { %v1292_v34 = vpack.c.bf16 %v1291_v32, %v1290_v30 }
 0xd52   :  { %2198 = vmatmul.mubr.msk.bf16.vlgmr.msra.gmra.mxu0 %vm109_vm1, %v1292_v34 }
 0xd53   :  { %2215 = vmatprep.mubr.msk.bf16.mxu0 %vm2353_vm0, %v2352_v1  ;;  %2208 = vmatpush3.bf16.msra.mxu0 %v2280_v35 }
 0xd54   :  { %2209 = vmatprep.subr.bf16.mxu0 %v2352_v1 }
 0xd57   :  { %2210 = vmatpush3.bf16.msra.mxu0 %v2281_v38 }
 0xd58   :  { %2211 = vmatprep.subr.bf16.mxu0 %v2352_v1 }
 0xd5b   :  { %2212 = vmatpush3.bf16.msra.mxu0 %v2282_v37 }
 0xd5c   :  { %2213 = vmatprep.subr.bf16.mxu0 %v2352_v1 }
 0xd5f   :  { %2214 = vmatpush3.bf16.msra.mxu0 %v2283_v44 }
 0xd60   :  { %2231 = vmatprep.subr.mxu0 %v1571_v47 }
 0xe12   :  { %v1346_v39 = vpop.f32.mrf.mxu0 }
 0xe14   :  { %v2199_v40 = vpop.f32.mrf.mxu0 }
 0xe16   :  { %v1349_v42 = vpop.f32.mrf.mxu0 }
 0xe17   :  { %v1353_v31 = vpack.c.bf16 %v1349_v42, %v1346_v39 }
 0xe18   :  { %v2200_v36 = vpop.f32.mrf.mxu0 }
 0xe19   :  { %2202 = vmatpush3.bf16.msra.mxu1 %v1353_v31 }
 0xe1a   :  { %2219 = vmatprep.subr.bf16.mxu1 %v2352_v1 }
 0xe1c   :  { %2204 = vmatmul.mubr.msk.bf16.vlgmr.msra.gmra.mxu1 %vm175_vm2, %v2534_v18 }
 0xe1d   :  { %2221 = vmatprep.mubr.msk.bf16.mxu1 %vm2353_vm0, %v2352_v1 }
 0xedc   :  { %v1388_v48 = vpop.f32.mrf.mxu1 }
 0xedd   :  { %v1395_v51 = vmax.f32 %v1388_v48, 0.0 }
 0xede   :  { %v2205_v49 = vpop.f32.mrf.mxu1 }
 0xee0   :  { %v1391_v50 = vpop.f32.mrf.mxu1 }
 0xee1   :  { %v1396_v52 = vmax.f32 %v1391_v50, 0.0 }
 0xee2   :  { %v2206_v54 = vpop.f32.mrf.mxu1 }
 0xee3   :  { %v1397_v55 = vpack.c.bf16 %v1396_v52, %v1395_v51 }
 0xee5   :  { %2216 = vmatmul.mubr.msk.bf16.vlgmr.msra.gmra.mxu0 %vm262_vm3, %v1397_v55 }
 0xee6   :  { %2233 = vmatprep.mubr.msk.f32.mxu0 %vm448_vm5, %v2755_v6  ;;  %2232 = vmatpush3.msra.mxu0 %v1571_v47 }
 0xee7   :  { %2236 = vmatprep.subr.mxu0 %v1571_v47 }
 0xeed   :  { %2234 = vmatmul.mubr.msk.f32.vlgmr.msra.gmra.mxu0 %vm448_vm5, %v2763_v10  ;;  %v1588_v10 = vpop.xlane.xlu1 %1587 }
 0xeee   :  { %2238 = vmatprep.mubr.msk.f32.mxu0 %vm448_vm5, %v2614_v63  ;;  %2237 = vmatpush3.msra.mxu0 %v1571_v47  ;;  %v1671_v17 = vadd.f32 %v1588_v10, %v1580_v14 }
 0xef1   :  { %2239 = vmatmul.mubr.msk.f32.vlgmr.msra.gmra.mxu0 %vm448_vm5, %v2618_v4  ;;  %v1701_v20 = vpop.xlane.xlu1 %1700 }
 0xef2   :  { %v1784_v43 = vadd.f32 %v1701_v20, %v1580_v14 }
 0xfa5   :  { %v1467_v7 = vpop.f32.mrf.mxu0 }
 0xfa7   :  { %v2217_v8 = vpop.f32.mrf.mxu0 }
 0xfa9   :  { %v1470_v11 = vpop.f32.mrf.mxu0 }
 0xfaa   :  { %v1474_v12 = vpack.c.bf16 %v1470_v11, %v1467_v7 }
 0xfab   :  { %v2218_v13 = vpop.f32.mrf.mxu0 }
 0xfac   :  { %2220 = vmatpush3.bf16.msra.mxu1 %v1474_v12 }
 0xfad   :  { %v2235_v15 = vpop.f32.mrf.mxu0  ;;  %2225 = vmatprep.subr.bf16.mxu1 %v2352_v1 }
 0xfae   :  { %v1673_v19 = vmul.f32 2.0, %v2235_v15 }
 0xfaf   :  { %2222 = vmatmul.mubr.msk.bf16.vlgmr.msra.gmra.mxu1 %vm175_vm2, %v2534_v18  ;;  %v1661_v21 = vpop.f32.mrf.mxu0 }
 0xfb0   :  { %v1675_v24 = vsub.f32 %v1671_v17, %v1673_v19  ;;  %v1672_v57 = vmul.f32 2.0, %v1661_v21  ;;  %2226 = vmatpush3.bf16.xpose.msra.mxu1 %v1105_v22  ;;  %2227 = vmatprep.mubr.msk.bf16.mxu1 %vm2353_vm0, %v2352_v1 }
 0xfb1   :  { %v2240_v41 = vpop.f32.mrf.mxu0 }
 0xfb2   :  { %v1677_v45 = vmax.f32 %v1675_v24, 0.0  ;;  %v1674_v46 = vsub.f32 %v1670_v23, %v1672_v57  ;;  %v1786_v25 = vmul.f32 2.0, %v2240_v41 }
 0xfb3   :  { %v1774_v27 = vpop.f32.mrf.mxu0 }
 0xfb4   :  { %v1679_v28 = vadd.f32 1.0, %v1677_v45  ;;  %v1676_v18 = vmax.f32 %v1674_v46, 0.0  ;;  %v1788_v29 = vsub.f32 %v1784_v43, %v1786_v25  ;;  %v1785_v30 = vmul.f32 2.0, %v1774_v27 }
 0xfb6   :  { %2284 = vrcp.f32 %v1679_v28  ;;  %v1678_v32 = vadd.f32 1.0, %v1676_v18  ;;  %v1787_v33 = vsub.f32 %v1783_v26, %v1785_v30  ;;  %v1790_v34 = vmax.f32 %v1788_v29, 0.0 }
 0xfb7   :  { %2228 = vmatmul.mubr.msk.bf16.vlgmr.msra.gmra.mxu1 %vm448_vm5, %v2744_v53 }
 0xfb8   :  { %2286 = vrcp.f32 %v1678_v32  ;;  %v1789_v1 = vmax.f32 %v1787_v33, 0.0  ;;  %v1792_v38 = vadd.f32 1.0, %v1790_v34 }
 0xfba   :  { %v1791_v35 = vadd.f32 1.0, %v1789_v1 }
 0xfbc   :  { %2288 = vrcp.f32 %v1791_v35 }
 0xfbd   :  { %2290 = vrcp.f32 %v1792_v38 }
 0xfc3   :  { %v2285_v39 = vpop.eup %2284 }
 0xfc4   :  { %v1687_v40 = vsel %vm1573_vm6, %v2285_v39, 0.0 }
 0xfc5   :  { %v2287_v42 = vpop.eup %2286  ;;  %1688 = vadd.xlane.f32.xlu1 %v1687_v40 }
 0xfc6   :  { %v1684_v31 = vsel %vm1573_vm6, %v2287_v42, 0.0 }
 0xfc9   :  { %v2289_v36 = vpop.eup %2288  ;;  %1685 = vadd.xlane.f32.xlu1 %v1684_v31 }
 0xfca   :  { %v1797_v37 = vsel %vm1573_vm6, %v2289_v36, 0.0  ;;  %v2291_v44 = vpop.eup %2290 }
 0xfcb   :  { %v1800_v53 = vsel %vm1573_vm6, %v2291_v44, 0.0 }
 0xfcd   :  { %1798 = vadd.xlane.f32.xlu1 %v1797_v37 }
 0xfd1   :  { %1801 = vadd.xlane.f32.xlu1 %v1800_v53 }
 0xfe2   :  { %1815 = vrot.lane.b32.xlu1 %v2614_v63, %s2354_s2 }
 0xfe6   :  { %1817 = vrot.lane.b32.xlu1 %v2618_v4, %s2354_s2  ;;  %s2359_s2 = smov 100  }
 0xfea   :  { %1821 = vrot.lane.b32.xlu1 %v2755_v6, %s2355_s21 }
 0xfee   :  { %1829 = vrot.lane.b32.xlu1 %v2597_v56, %s2356_s8 }
0x104e   :  { %v1689_v47 = vpop.xlane.xlu1 %1688 }
0x1052   :  { %v1686_v48 = vpop.xlane.xlu1 %1685 }
0x1053   :  { %2292 = vrcp.f32 %v1686_v48 }
0x1054   :  { %2294 = vrcp.f32 %v1689_v47 }
0x1056   :  { %v1799_v49 = vpop.xlane.xlu1 %1798 }
0x1057   :  { %2296 = vrcp.f32 %v1799_v49 }
0x105a   :  { %v1802_v50 = vpop.xlane.xlu1 %1801 }
0x105b   :  { %2298 = vrcp.f32 %v1802_v50 }
0x1060   :  { %v2293_v63 = vpop.eup %2292 }
0x1061   :  { %v2295_v55 = vpop.eup %2294  ;;  %v1691_v58 = vmul.f32 %v2293_v63, %v2287_v42 }
0x1062   :  { %v1693_v62 = vmul.f32 %v2295_v55, %v2285_v39 }
0x1064   :  { %v2297_v59 = vpop.eup %2296 }
0x1065   :  { %v1804_v2 = vmul.f32 %v2297_v59, %v2289_v36 }
0x1068   :  { %v2299_v5 = vpop.eup %2298 }
0x1069   :  { %v1806_v11 = vmul.f32 %v2299_v5, %v2291_v44 }
0x106f   :  { %v1509_v51 = vpop.f32.mrf.mxu1 }
0x1070   :  { %v1516_v52 = vmax.f32 %v1509_v51, 0.0 }
0x1071   :  { %v2223_v54 = vpop.f32.mrf.mxu1 }
0x1072   :  { %1809 = vrot.lane.b32.xlu1 %v1516_v52, %s2357_s24 }
0x1073   :  { %v1512_v4 = vpop.f32.mrf.mxu1 }
0x1074   :  { %v1517_v6 = vmax.f32 %v1512_v4, 0.0 }
0x1075   :  { %v2224_v56 = vpop.f32.mrf.mxu1 }
0x1076   :  { %1811 = vrot.lane.b32.xlu0 %v1517_v6, %s2357_s24  ;;  %1837 = vrot.lane.b32.xlu1 %v1691_v58, %s2358_s25 }
0x1077   :  { %v1552_v60 = vpop.f32.mrf.mxu1 }
0x1078   :  { %v1559_v61 = vsub.f32 0.0, %v1552_v60 }
0x1079   :  { %v2229_v7 = vpop.f32.mrf.mxu1 }
0x107a   :  { %v1561_v8 = vmul.f32 1.442695, %v1559_v61  ;;  %1839 = vrot.lane.b32.xlu0 %v1693_v62, %s2358_s25  ;;  %1845 = vrot.lane.b32.xlu1 %v1804_v2, %s2359_s2 }
0x107b   :  { %v1555_v9 = vpop.f32.mrf.mxu1 }
0x107c   :  { %2300 = vpow2.f32 %v1561_v8  ;;  %v1560_v10 = vsub.f32 0.0, %v1555_v9 }
0x107d   :  { %v2230_v12 = vpop.f32.mrf.mxu1 }
0x107e   :  { %v1563_v13 = vmul.f32 1.442695, %v1560_v10  ;;  %1847 = vrot.lane.b32.xlu0 %v1806_v11, %s2359_s2 }
0x1080   :  { %2302 = vpow2.f32 %v1563_v13 }
0x1089   :  { %v2301_v14 = vpop.eup %2300 }
0x108a   :  { %v1565_v15 = vadd.f32 1.0, %v2301_v14 }
0x108c   :  { %2304 = vrcp.f32 %v1565_v15 }
0x108d   :  { %v2303_v16 = vpop.eup %2302 }
0x108e   :  { %v1566_v17 = vadd.f32 1.0, %v2303_v16 }
0x1090   :  { %2306 = vrcp.f32 %v1566_v17 }
0x1099   :  { %v2305_v19 = vpop.eup %2304 }
0x109a   :  { %1872 = vst.msk [vmem:[#allocation4] sm:$0xff] %vm175_vm2, %v2305_v19 }
0x109d   :  { %v2307_v20 = vpop.eup %2306 }
0x109e   :  { %1873 = vst.msk [vmem:[#allocation4 + $0x8] sm:$0xff] %vm175_vm2, %v2307_v20 }
0x109f   :  { %2319 = shalt.err (!%p2316_p4)
}
0x10a0   :  { %s2361_s19 = smov 128   ;;  %s2362_s14 = smov 8   ;;  %v1816_v21 = vpop.permute.xlu1 %1815  ;;  %v1824_v24 = vpop.permute.xlu0 %1823  ;;  %v1934_v57 = vld [vmem:[%s2894_s17] ss:$0 sm:$0xff]  ;;  %vm1855_vm7 = vcmask 588800   ;;  %vm1858_vm8 = vcmask 654336  }
0x10a1   :  { %1897 = dma.vmem_to_hbm [thread:$0]  %s1892_s3, 256, %s2904_s27, [#allocation5], %s2361_s19, %s2361_s19, %s2362_s14   ;;  %v709_v43 = vadd.f32 %v1934_v57, %v2707_v0  ;;  %v712_v27 = vadd.f32 %v1934_v57, %v2709_v3  ;;  %vm1861_vm9 = vcmask 785408   ;;  %vm1864_vm10 = vcmask 818176  }
0x10a2   :  { %vm1867_vm11 = vcmask 850944   ;;  %s2363_s17 = smov [#allocation2]  }
0x10a3   :  { %s1879_s27 = sshll.u32 %s2363_s17, 4  ;;  %s1880_s27 = int_to_ptr.vmem [resolvable:$true] %s1879_s27 }
0x10a4   :  { %v1818_v22 = vpop.permute.xlu1 %1817  ;;  %v1832_v45 = vpop.permute.xlu0 %1831  ;;  %s2328_s30 = scalar_lea.vmem %s1880_s27, 256  ;;  %p2333_p6 = scmp.lt.s32.totalorder %s1880_s27, %s1880_s27 }
0x10a5   :  { %p2329_p5 = scmp.ne.s32.totalorder %s1880_s27, %s2328_s30  ;;  %p2334_p7 = scmp.lt.s32.totalorder %s2328_s30, %s2328_s30 }
0x10a7   :  { %p2335_p8 = por %p2334_p7, %p2333_p6 }
0x10a8   :  { %v1822_v23 = vpop.permute.xlu1 %1821 }
0x10a9   :  { %p2336_p9 = pnand %p2335_p8, %p2329_p5 }
0x10ac   :  { %v1830_v41 = vpop.permute.xlu1 %1829 }
0x10e4   :  { %v1810_v46 = vpop.permute.xlu1 %1809 }
0x10e5   :  { %v1851_v25 = vsel %vm109_vm1, %v709_v43, %v1810_v46 }
0x10e6   :  { %v1853_v26 = vsel %vm262_vm3, %v1851_v25, %v1816_v21 }
0x10e7   :  { %v1856_v28 = vsel %vm1855_vm7, %v1853_v26, %v1822_v23 }
0x10e8   :  { %v1812_v18 = vpop.permute.xlu0 %1811  ;;  %v1838_v29 = vpop.permute.xlu1 %1837  ;;  %v1859_v32 = vsel %vm1858_vm8, %v1856_v28, %v1830_v41 }
0x10e9   :  { %v1852_v30 = vsel %vm109_vm1, %v712_v27, %v1812_v18  ;;  %v1862_v34 = vsel %vm1861_vm9, %v1859_v32, %v1838_v29 }
0x10ea   :  { %v1854_v33 = vsel %vm262_vm3, %v1852_v30, %v1818_v22 }
0x10eb   :  { %v1857_v0 = vsel %vm1855_vm7, %v1854_v33, %v1824_v24 }
0x10ec   :  { %v1840_v1 = vpop.permute.xlu0 %1839  ;;  %v1846_v35 = vpop.permute.xlu1 %1845  ;;  %v1860_v38 = vsel %vm1858_vm8, %v1857_v0, %v1832_v45 }
0x10ed   :  { %v1865_v39 = vsel %vm1864_vm10, %v1862_v34, %v1846_v35  ;;  %v1863_v3 = vsel %vm1861_vm9, %v1860_v38, %v1840_v1 }
0x10ee   :  { %v1868_v40 = vsel %vm1867_vm11, %v1865_v39, 0.0 }
0x10ef   :  { %1870 = vst [vmem:[#allocation2] sm:$0xff] %v1868_v40 }
0x10f0   :  { %v1848_v42 = vpop.permute.xlu0 %1847 }
0x10f1   :  { %v1866_v31 = vsel %vm1864_vm10, %v1863_v3, %v1848_v42 }
0x10f2   :  { %v1869_v36 = vsel %vm1867_vm11, %v1866_v31, 0.0 }
0x10f3   :  { %1871 = vst [vmem:[#allocation2 + $0x8] sm:$0xff] %v1869_v36 }
0x10f4   :  { %2339 = shalt.err (!%p2336_p9)
}
0x10f5   :  { %1885 = dma.vmem_to_hbm [thread:$0]  %s1880_s27, 256, %s2903_s26, [#allocation3], %s2361_s19, %s2361_s19, %s2362_s14  }
0x10f6   :  { %2348 = dma.done.wait [#allocation3], 256  }
0x10f7   :  { %2349 = vsyncadd [#allocation3], 4294967040 }
0x10f8   :  { %2350 = dma.done.wait [#allocation5], 256  }
0x10f9   :  { %2351 = vsyncadd [#allocation5], 4294967040 }
0x10fa   :  { %1904 = vsyncpa [#allocation3], 1 }
0x10fb   :  { %1905 = vsyncpa [#allocation5], 1 }

</bundles_post_ra>
